<compile_context>
chip_gen: v6e
topology: v6e:2x2x1
jax: 0.10.0
libtpu: 0.0.40
codegen_flags: <defaults>
</compile_context>

<pallas_src>
import functools

import numpy as np

import jax
import jax.numpy as jnp
from jax.experimental import pallas as pl
from jax.experimental.pallas import tpu as pltpu

BN_EPS = 1e-5


# ------------------------------- fused kernel ------------------------------- #

def convnet_fused_kernel(pat1_ref, mask2_ref,               # (4*G1, 9*C0) im2col, (Q, 1) mask
                         w1_ref, g1_ref, be1_ref,           # conv1 taps (9*C0, C1), BN1 (1, C1)
                         w2_ref, g2_ref, be2_ref,           # conv2 taps (9*C1, C2), BN2 (1, C2)
                         wm1_ref, bm1_ref,                   # MLP W1 (4*C2, HID) permuted, b1 (1, HID)
                         wm2_ref, bm2_ref,                   # MLP W2 (HID, OUT), b2 (1, OUT)
                         o_ref,                              # (N, OUT) logits
                         p1_ref, p2_ref,                     # VMEM scratch
                         *, N, Hp1, Wp1, Ho2, Wo2, Hp2, Wp2):
    f32 = jnp.float32
    C1 = w1_ref.shape[1]
    C2 = w2_ref.shape[1]
    G1 = N * Hp1 * Wp1                 # pooled stage-1 positions (= p1 rows)
    Q = mask2_ref.shape[0]             # extended conv-2 output rows (flat-offset trick)
    n_valid2 = float(N * Ho2 * Wo2)    # real conv-2 output positions

    # ---- ConvBlock 1: host-built im2col -> ONE matmul (conv bias cancelled by BN). ----
    z1 = jnp.dot(pat1_ref[...], w1_ref[...], preferred_element_type=f32)   # (4*G1, C1)

    # ---- BatchNorm2d(C1), training-mode batch stats (two-pass variance) + ReLU. ----
    m1 = jnp.mean(z1, axis=0, keepdims=True)
    d1 = z1 - m1
    v1 = jnp.mean(d1 * d1, axis=0, keepdims=True)
    y1 = jnp.maximum(d1 * jax.lax.rsqrt(v1 + BN_EPS) * g1_ref[...] + be1_ref[...], 0.0)

    # ---- MaxPool2d(2): rows are pool-member-major, so pooling is a max over four
    #      contiguous, 8-aligned G1-row slabs (3 VPU maxes, no loop, no masked stores). ----
    p1 = jnp.maximum(jnp.maximum(y1[0:G1, :], y1[G1:2 * G1, :]),
                     jnp.maximum(y1[2 * G1:3 * G1, :], y1[3 * G1:4 * G1, :]))
    p1_ref[...] = p1                   # rows in raster order (n, hp, wp)

    # ---- ConvBlock 2 via flat-offset taps: tap (di, dj) is a constant row shift
    #      di*Wp1 + dj of the flattened p1, so each tap is ONE contiguous (Q, C1) read
    #      and ONE K=C1 matmul; wrap-around rows are junk (masked out below). ----
    ext = None
    for di in range(3):
        for dj in range(3):
            off = di * Wp1 + dj
            k = di * 3 + dj
            t = jnp.dot(p1_ref[off:off + Q, :],
                        w2_ref[k * C1:(k + 1) * C1, :],      # 32-row slices: 8-aligned
                        preferred_element_type=f32)
            ext = t if ext is None else ext + t               # (Q, C2)

    # ---- BatchNorm2d(C2): stats over the valid rows only (host-built 0/1 mask) + ReLU. ----
    mask = mask2_ref[...]                                     # (Q, 1)
    m2 = jnp.sum(ext * mask, axis=0, keepdims=True) / n_valid2
    d2 = (ext - m2) * mask
    v2 = jnp.sum(d2 * d2, axis=0, keepdims=True) / n_valid2
    y2 = jnp.maximum((ext - m2) * jax.lax.rsqrt(v2 + BN_EPS) * g2_ref[...] + be2_ref[...],
                     0.0)                                     # junk rows finite, never read

    # ---- MaxPool2d(2) + NCHW flatten into a lane-dense (N, n_pos*C2) scratch
    #      (j-major, channel-minor columns; W1 was row-permuted on the host to match). ----
    for n in range(N):
        for hp in range(Hp2):
            for wp in range(Wp2):
                q0 = n * (Hp1 * Wp1) + (2 * hp) * Wp1 + 2 * wp
                q1 = q0 + Wp1
                w4 = jnp.maximum(y2[q0:q0 + 2, :], y2[q1:q1 + 2, :])      # (2, C2)
                j = hp * Wp2 + wp
                p2_ref[n:n + 1, j * C2:(j + 1) * C2] = jnp.max(w4, axis=0, keepdims=True)

    # ---- MLP: Linear -> ReLU -> Dropout(0.0)=identity -> Linear (two matmuls). ----
    h = jnp.maximum(jnp.dot(p2_ref[...], wm1_ref[...], preferred_element_type=f32)
                    + bm1_ref[...], 0.0)
    o_ref[...] = jnp.dot(h, wm2_ref[...], preferred_element_type=f32) + bm2_ref[...]


# ------------------------------- call wrapper ------------------------------- #

def _full_spec(shape):
    nd = len(shape)
    return pl.BlockSpec(tuple(shape), lambda i, nd=nd: (0,) * nd)


def convnet_forward(x_nchw, conv_params, mlp_params):
    """Forward of ConvNet([2,32,64], 50, digit=False). Returns [logits] like the torch model."""
    (w1, _b1, g1, be1), (w2, _b2, g2, be2) = conv_params
    wm1, bm1, wm2, bm2 = mlp_params

    x = jnp.transpose(x_nchw, (0, 2, 3, 1)).astype(jnp.float32)       # NCHW -> NHWC
    N, H, W, C0 = x.shape
    C1, C2 = w1.shape[0], w2.shape[0]
    HID, OUT = wm1.shape[1], wm2.shape[1]

    Ho1, Wo1 = H - 2, W - 2
    Hp1, Wp1 = Ho1 // 2, Wo1 // 2
    Ho2, Wo2 = Hp1 - 2, Wp1 - 2
    Hp2, Wp2 = Ho2 // 2, Wo2 // 2
    n_pos = Hp2 * Wp2
    G1 = N * Hp1 * Wp1
    assert wm1.shape[0] == C2 * n_pos

    # Host-side (XLA) im2col for conv1; rows in pool-member-major order:
    #   row = (a*2 + b)*G1 + ((n*Hp1 + hp)*Wp1 + wp)  for output pixel (h, w) = (2hp+a, 2wp+b)
    # so the in-kernel MaxPool1 is a max over four contiguous G1-row slabs.
    cols = [x[:, di:di + Ho1, dj:dj + Wo1, :] for di in range(3) for dj in range(3)]
    pat = jnp.concatenate(cols, axis=-1)                               # (N, Ho1, Wo1, 9*C0)
    pat = pat.reshape(N, Hp1, 2, Wp1, 2, 9 * C0)
    pat = jnp.transpose(pat, (2, 4, 0, 1, 3, 5))                       # (a, b, n, hp, wp, f)
    patches1 = pat.reshape(4 * G1, 9 * C0)

    # Conv weights (Cout, Cin, 3, 3) -> tap-major (9*Cin, Cout); tap k = di*3 + dj.
    w1t = jnp.transpose(w1, (2, 3, 1, 0)).reshape(9 * C0, C1)
    w2t = jnp.transpose(w2, (2, 3, 1, 0)).reshape(9 * C1, C2)

    # Validity mask for conv2's flat-offset formulation (built once, on the host).
    Q = (N - 1) * Hp1 * Wp1 + (Ho2 - 1) * Wp1 + Wo2
    q = np.arange(Q)
    r = q % (Hp1 * Wp1)
    mask2 = jnp.asarray((((r // Wp1) < Ho2) & ((r % Wp1) < Wo2)).astype(np.float32)).reshape(Q, 1)

    # Fold PyTorch's NCHW flatten (feature = c*n_pos + j) into a one-time row permutation
    # of W1 so the kernel's lane-dense (j-major, c-minor) p2 is consumed directly.
    ridx = jnp.arange(C2 * n_pos)
    wm1p = wm1[(ridx % C2) * n_pos + (ridx // C2), :]

    # Conv biases are NOT passed: training-mode BatchNorm right after each conv removes
    # them exactly (mean(z + b) = mean(z) + b).

    args = (patches1, mask2,
            w1t, g1.reshape(1, C1), be1.reshape(1, C1),
            w2t, g2.reshape(1, C2), be2.reshape(1, C2),
            wm1p, bm1.reshape(1, HID),
            wm2, bm2.reshape(1, OUT))

    kernel = functools.partial(convnet_fused_kernel, N=N, Hp1=Hp1, Wp1=Wp1,
                               Ho2=Ho2, Wo2=Wo2, Hp2=Hp2, Wp2=Wp2)

    logits = pl.pallas_call(
        kernel,
        grid=(1,),
        in_specs=[_full_spec(a.shape) for a in args],
        out_specs=_full_spec((N, OUT)),
        out_shape=jax.ShapeDtypeStruct((N, OUT), jnp.float32),
        scratch_shapes=[
            pltpu.VMEM((G1, C1), jnp.float32),             # pooled conv-1 output (raster order)
            pltpu.VMEM((N, n_pos * C2), jnp.float32),      # lane-dense pooled conv-2 output
        ],
        compiler_params=pltpu.CompilerParams(dimension_semantics=("arbitrary",)),
    )(*args)
    return [logits]


# ------------------------------ XLA reference ------------------------------- #

def convnet_reference(x_nchw, conv_params, mlp_params):
    """Pure-XLA reference with the exact torch .train() forward semantics (incl. conv bias)."""
    x = x_nchw.astype(jnp.float32)
    for (w, b, g, be) in conv_params:
        x = jax.lax.conv_general_dilated(
            x, w, window_strides=(1, 1), padding="VALID",
            dimension_numbers=("NCHW", "OIHW", "NCHW")) + b.reshape(1, -1, 1, 1)
        m = jnp.mean(x, axis=(0, 2, 3), keepdims=True)
        v = jnp.mean((x - m) ** 2, axis=(0, 2, 3), keepdims=True)
        x = (x - m) * jax.lax.rsqrt(v + BN_EPS) * g.reshape(1, -1, 1, 1) + be.reshape(1, -1, 1, 1)
        x = jnp.maximum(x, 0.0)
        n_, c_, h_, w_ = x.shape
        x = x.reshape(n_, c_, h_ // 2, 2, w_ // 2, 2).max(axis=(3, 5))
    wm1, bm1, wm2, bm2 = mlp_params
    h = jnp.maximum(x.reshape(x.shape[0], -1) @ wm1 + bm1, 0.0)
    return h @ wm2 + bm2


# -------------------------------- parameters -------------------------------- #

def init_params(key, channels=(2, 32, 64), hidden=50, out_features=2):
    """Deterministic synthetic parameters mirroring the PyTorch module's shapes."""
    conv_params = []
    for i in range(len(channels) - 1):
        cin, cout = channels[i], channels[i + 1]
        key, k1, k2 = jax.random.split(key, 3)
        bound = 1.0 / (cin * 9.0) ** 0.5
        w = jax.random.uniform(k1, (cout, cin, 3, 3), jnp.float32, -bound, bound)
        b = jax.random.uniform(k2, (cout,), jnp.float32, -bound, bound)
        gamma = jnp.ones((cout,), jnp.float32)   # BatchNorm2d default weight
        beta = jnp.zeros((cout,), jnp.float32)   # BatchNorm2d default bias
        conv_params.append((w, b, gamma, beta))

    in_features = channels[-1] * 4
    key, k1, k2, k3, k4 = jax.random.split(key, 5)
    bnd1 = 1.0 / float(in_features) ** 0.5
    w1 = jax.random.uniform(k1, (in_features, hidden), jnp.float32, -bnd1, bnd1)   # torch W1.T
    b1 = jax.random.uniform(k2, (hidden,), jnp.float32, -bnd1, bnd1)
    bnd2 = 1.0 / float(hidden) ** 0.5
    w2 = jax.random.uniform(k3, (hidden, out_features), jnp.float32, -bnd2, bnd2)  # torch W2.T
    b2 = jax.random.uniform(k4, (out_features,), jnp.float32, -bnd2, bnd2)
    return conv_params, (w1, b1, w2, b2)


# ----------------------------------- main ------------------------------------ #

if __name__ == "__main__":
    key = jax.random.PRNGKey(0)
    key, kx = jax.random.split(key)

    # ConvNet([2, 32, 64], 50): input is a pair of 14x14 digit images -> (N, 2, 14, 14).
    x = jax.random.normal(kx, (2, 2, 14, 14), dtype=jnp.float32)

    conv_params, mlp_params = init_params(key)

    fwd = jax.jit(lambda xx: convnet_forward(xx, conv_params, mlp_params))
    outputs = fwd(x)
    logits = jax.block_until_ready(outputs[0])

    assert logits.shape == (2, 2), logits.shape
    assert bool(jnp.all(jnp.isfinite(logits)))

    ref = convnet_reference(x, conv_params, mlp_params)
    max_err = float(jnp.max(jnp.abs(logits - ref)))
    assert max_err < 5e-2, f"kernel deviates from XLA reference: max|diff|={max_err}"

    print("KERNEL_OK")
</pallas_src>

<mosaic_0001>
module attributes {stable_mosaic.version = 11 : i64} {
  func.func @convnet_fused_kernel(%arg0: i32, %arg1: memref<288x18xf32, #tpu.memory_space<vmem>>, %arg2: memref<58x1xf32, #tpu.memory_space<vmem>>, %arg3: memref<18x32xf32, #tpu.memory_space<vmem>>, %arg4: memref<1x32xf32, #tpu.memory_space<vmem>>, %arg5: memref<1x32xf32, #tpu.memory_space<vmem>>, %arg6: memref<288x64xf32, #tpu.memory_space<vmem>>, %arg7: memref<1x64xf32, #tpu.memory_space<vmem>>, %arg8: memref<1x64xf32, #tpu.memory_space<vmem>>, %arg9: memref<256x50xf32, #tpu.memory_space<vmem>>, %arg10: memref<1x50xf32, #tpu.memory_space<vmem>>, %arg11: memref<50x2xf32, #tpu.memory_space<vmem>>, %arg12: memref<1x2xf32, #tpu.memory_space<vmem>>, %arg13: memref<2x2xf32, #tpu.memory_space<vmem>>, %arg14: memref<72x32xf32, #tpu.memory_space<vmem>>, %arg15: memref<2x256xf32, #tpu.memory_space<vmem>>) attributes {dimension_semantics = [#tpu.dimension_semantics<arbitrary>], iteration_bounds = array<i64: 1>, scalar_prefetch = 0 : i64, scratch_operands = 2 : i64, tpu.core_type = #tpu.core_type<tc>, window_params = [{pipeline_mode = #tpu.pipeline_mode<synchronous>, transform_indices = @transform_0, window_bounds = array<i64: 288, 18>}, {pipeline_mode = #tpu.pipeline_mode<synchronous>, transform_indices = @transform_1, window_bounds = array<i64: 58, 1>}, {pipeline_mode = #tpu.pipeline_mode<synchronous>, transform_indices = @transform_2, window_bounds = array<i64: 18, 32>}, {pipeline_mode = #tpu.pipeline_mode<synchronous>, transform_indices = @transform_3, window_bounds = array<i64: 1, 32>}, {pipeline_mode = #tpu.pipeline_mode<synchronous>, transform_indices = @transform_4, window_bounds = array<i64: 1, 32>}, {pipeline_mode = #tpu.pipeline_mode<synchronous>, transform_indices = @transform_5, window_bounds = array<i64: 288, 64>}, {pipeline_mode = #tpu.pipeline_mode<synchronous>, transform_indices = @transform_6, window_bounds = array<i64: 1, 64>}, {pipeline_mode = #tpu.pipeline_mode<synchronous>, transform_indices = @transform_7, window_bounds = array<i64: 1, 64>}, {pipeline_mode = #tpu.pipeline_mode<synchronous>, transform_indices = @transform_8, window_bounds = array<i64: 256, 50>}, {pipeline_mode = #tpu.pipeline_mode<synchronous>, transform_indices = @transform_9, window_bounds = array<i64: 1, 50>}, {pipeline_mode = #tpu.pipeline_mode<synchronous>, transform_indices = @transform_10, window_bounds = array<i64: 50, 2>}, {pipeline_mode = #tpu.pipeline_mode<synchronous>, transform_indices = @transform_11, window_bounds = array<i64: 1, 2>}, {pipeline_mode = #tpu.pipeline_mode<synchronous>, transform_indices = @transform_12, window_bounds = array<i64: 2, 2>}]} {
    %c0 = arith.constant 0 : index
    %c0_0 = arith.constant 0 : index
    %0 = vector.load %arg1[%c0, %c0_0] : memref<288x18xf32, #tpu.memory_space<vmem>>, vector<288x18xf32>
    %c0_1 = arith.constant 0 : index
    %c0_2 = arith.constant 0 : index
    %1 = vector.load %arg3[%c0_1, %c0_2] : memref<18x32xf32, #tpu.memory_space<vmem>>, vector<18x32xf32>
    %cst = arith.constant dense<0.000000e+00> : vector<288x32xf32>
    %2 = tpu.matmul %0, %1, %cst {dimension_numbers = #tpu.dot_dimension_numbers<[1], [0], [0], [1], [0, 0, 1, 1], [], []>} : vector<288x18xf32>, vector<18x32xf32>, vector<288x32xf32> -> vector<288x32xf32>
    %cst_3 = arith.constant dense<0.000000e+00> : vector<32xf32>
    %3 = vector.multi_reduction <add>, %2, %cst_3 [0] : vector<288x32xf32> to vector<32xf32>
    %4 = vector.shape_cast %3 : vector<32xf32> to vector<1x32xf32>
    %cst_4 = arith.constant 2.880000e+02 : f32
    %5 = vector.broadcast %cst_4 : f32 to vector<1x32xf32>
    %6 = arith.divf %4, %5 : vector<1x32xf32>
    %7 = vector.broadcast %6 : vector<1x32xf32> to vector<288x32xf32>
    %8 = arith.subf %2, %7 : vector<288x32xf32>
    %9 = arith.mulf %8, %8 : vector<288x32xf32>
    %cst_5 = arith.constant dense<0.000000e+00> : vector<32xf32>
    %10 = vector.multi_reduction <add>, %9, %cst_5 [0] : vector<288x32xf32> to vector<32xf32>
    %11 = vector.shape_cast %10 : vector<32xf32> to vector<1x32xf32>
    %cst_6 = arith.constant 2.880000e+02 : f32
    %12 = vector.broadcast %cst_6 : f32 to vector<1x32xf32>
    %13 = arith.divf %11, %12 : vector<1x32xf32>
    %cst_7 = arith.constant 9.99999974E-6 : f32
    %14 = vector.broadcast %cst_7 : f32 to vector<1x32xf32>
    %15 = arith.addf %13, %14 : vector<1x32xf32>
    %16 = math.rsqrt %15 : vector<1x32xf32>
    %17 = vector.broadcast %16 : vector<1x32xf32> to vector<288x32xf32>
    %18 = arith.mulf %8, %17 : vector<288x32xf32>
    %c0_8 = arith.constant 0 : index
    %c0_9 = arith.constant 0 : index
    %19 = vector.load %arg4[%c0_8, %c0_9] : memref<1x32xf32, #tpu.memory_space<vmem>>, vector<1x32xf32>
    %20 = vector.broadcast %19 : vector<1x32xf32> to vector<288x32xf32>
    %21 = arith.mulf %18, %20 : vector<288x32xf32>
    %c0_10 = arith.constant 0 : index
    %c0_11 = arith.constant 0 : index
    %22 = vector.load %arg5[%c0_10, %c0_11] : memref<1x32xf32, #tpu.memory_space<vmem>>, vector<1x32xf32>
    %23 = vector.broadcast %22 : vector<1x32xf32> to vector<288x32xf32>
    %24 = arith.addf %21, %23 : vector<288x32xf32>
    %cst_12 = arith.constant 0.000000e+00 : f32
    %25 = vector.broadcast %cst_12 : f32 to vector<288x32xf32>
    %26 = arith.maximumf %24, %25 : vector<288x32xf32>
    %27 = vector.extract_strided_slice %26 {offsets = [0, 0], sizes = [72, 32], strides = [1, 1]} : vector<288x32xf32> to vector<72x32xf32>
    %28 = vector.extract_strided_slice %26 {offsets = [72, 0], sizes = [72, 32], strides = [1, 1]} : vector<288x32xf32> to vector<72x32xf32>
    %29 = arith.maximumf %27, %28 : vector<72x32xf32>
    %30 = vector.extract_strided_slice %26 {offsets = [144, 0], sizes = [72, 32], strides = [1, 1]} : vector<288x32xf32> to vector<72x32xf32>
    %31 = vector.extract_strided_slice %26 {offsets = [216, 0], sizes = [72, 32], strides = [1, 1]} : vector<288x32xf32> to vector<72x32xf32>
    %32 = arith.maximumf %30, %31 : vector<72x32xf32>
    %33 = arith.maximumf %29, %32 : vector<72x32xf32>
    %c0_13 = arith.constant 0 : index
    %c0_14 = arith.constant 0 : index
    %34 = vector.load %arg14[%c0_13, %c0_14] : memref<72x32xf32, #tpu.memory_space<vmem>>, vector<72x32xf32>
    tpu.vector_store %arg14[%c0_13, %c0_14], %33 {strides = array<i32>} : memref<72x32xf32, #tpu.memory_space<vmem>>, vector<72x32xf32>,
    %c0_15 = arith.constant 0 : index
    %c0_16 = arith.constant 0 : index
    %35 = vector.load %arg14[%c0_15, %c0_16] : memref<72x32xf32, #tpu.memory_space<vmem>>, vector<58x32xf32>
    %c0_17 = arith.constant 0 : index
    %c0_18 = arith.constant 0 : index
    %36 = vector.load %arg6[%c0_17, %c0_18] : memref<288x64xf32, #tpu.memory_space<vmem>>, vector<32x64xf32>
    %cst_19 = arith.constant dense<0.000000e+00> : vector<58x64xf32>
    %37 = tpu.matmul %35, %36, %cst_19 {dimension_numbers = #tpu.dot_dimension_numbers<[1], [0], [0], [1], [0, 0, 1, 1], [], []>} : vector<58x32xf32>, vector<32x64xf32>, vector<58x64xf32> -> vector<58x64xf32>
    %c1 = arith.constant 1 : index
    %c0_20 = arith.constant 0 : index
    %38 = vector.load %arg14[%c1, %c0_20] : memref<72x32xf32, #tpu.memory_space<vmem>>, vector<58x32xf32>
    %c32 = arith.constant 32 : index
    %c0_21 = arith.constant 0 : index
    %39 = vector.load %arg6[%c32, %c0_21] : memref<288x64xf32, #tpu.memory_space<vmem>>, vector<32x64xf32>
    %cst_22 = arith.constant dense<0.000000e+00> : vector<58x64xf32>
    %40 = tpu.matmul %38, %39, %cst_22 {dimension_numbers = #tpu.dot_dimension_numbers<[1], [0], [0], [1], [0, 0, 1, 1], [], []>} : vector<58x32xf32>, vector<32x64xf32>, vector<58x64xf32> -> vector<58x64xf32>
    %41 = arith.addf %37, %40 : vector<58x64xf32>
    %c2 = arith.constant 2 : index
    %c0_23 = arith.constant 0 : index
    %42 = vector.load %arg14[%c2, %c0_23] : memref<72x32xf32, #tpu.memory_space<vmem>>, vector<58x32xf32>
    %c64 = arith.constant 64 : index
    %c0_24 = arith.constant 0 : index
    %43 = vector.load %arg6[%c64, %c0_24] : memref<288x64xf32, #tpu.memory_space<vmem>>, vector<32x64xf32>
    %cst_25 = arith.constant dense<0.000000e+00> : vector<58x64xf32>
    %44 = tpu.matmul %42, %43, %cst_25 {dimension_numbers = #tpu.dot_dimension_numbers<[1], [0], [0], [1], [0, 0, 1, 1], [], []>} : vector<58x32xf32>, vector<32x64xf32>, vector<58x64xf32> -> vector<58x64xf32>
    %45 = arith.addf %41, %44 : vector<58x64xf32>
    %c6 = arith.constant 6 : index
    %c0_26 = arith.constant 0 : index
    %46 = vector.load %arg14[%c6, %c0_26] : memref<72x32xf32, #tpu.memory_space<vmem>>, vector<58x32xf32>
    %c96 = arith.constant 96 : index
    %c0_27 = arith.constant 0 : index
    %47 = vector.load %arg6[%c96, %c0_27] : memref<288x64xf32, #tpu.memory_space<vmem>>, vector<32x64xf32>
    %cst_28 = arith.constant dense<0.000000e+00> : vector<58x64xf32>
    %48 = tpu.matmul %46, %47, %cst_28 {dimension_numbers = #tpu.dot_dimension_numbers<[1], [0], [0], [1], [0, 0, 1, 1], [], []>} : vector<58x32xf32>, vector<32x64xf32>, vector<58x64xf32> -> vector<58x64xf32>
    %49 = arith.addf %45, %48 : vector<58x64xf32>
    %c7 = arith.constant 7 : index
    %c0_29 = arith.constant 0 : index
    %50 = vector.load %arg14[%c7, %c0_29] : memref<72x32xf32, #tpu.memory_space<vmem>>, vector<58x32xf32>
    %c128 = arith.constant 128 : index
    %c0_30 = arith.constant 0 : index
    %51 = vector.load %arg6[%c128, %c0_30] : memref<288x64xf32, #tpu.memory_space<vmem>>, vector<32x64xf32>
    %cst_31 = arith.constant dense<0.000000e+00> : vector<58x64xf32>
    %52 = tpu.matmul %50, %51, %cst_31 {dimension_numbers = #tpu.dot_dimension_numbers<[1], [0], [0], [1], [0, 0, 1, 1], [], []>} : vector<58x32xf32>, vector<32x64xf32>, vector<58x64xf32> -> vector<58x64xf32>
    %53 = arith.addf %49, %52 : vector<58x64xf32>
    %c8 = arith.constant 8 : index
    %c0_32 = arith.constant 0 : index
    %54 = vector.load %arg14[%c8, %c0_32] : memref<72x32xf32, #tpu.memory_space<vmem>>, vector<58x32xf32>
    %c160 = arith.constant 160 : index
    %c0_33 = arith.constant 0 : index
    %55 = vector.load %arg6[%c160, %c0_33] : memref<288x64xf32, #tpu.memory_space<vmem>>, vector<32x64xf32>
    %cst_34 = arith.constant dense<0.000000e+00> : vector<58x64xf32>
    %56 = tpu.matmul %54, %55, %cst_34 {dimension_numbers = #tpu.dot_dimension_numbers<[1], [0], [0], [1], [0, 0, 1, 1], [], []>} : vector<58x32xf32>, vector<32x64xf32>, vector<58x64xf32> -> vector<58x64xf32>
    %57 = arith.addf %53, %56 : vector<58x64xf32>
    %c12 = arith.constant 12 : index
    %c0_35 = arith.constant 0 : index
    %58 = vector.load %arg14[%c12, %c0_35] : memref<72x32xf32, #tpu.memory_space<vmem>>, vector<58x32xf32>
    %c192 = arith.constant 192 : index
    %c0_36 = arith.constant 0 : index
    %59 = vector.load %arg6[%c192, %c0_36] : memref<288x64xf32, #tpu.memory_space<vmem>>, vector<32x64xf32>
    %cst_37 = arith.constant dense<0.000000e+00> : vector<58x64xf32>
    %60 = tpu.matmul %58, %59, %cst_37 {dimension_numbers = #tpu.dot_dimension_numbers<[1], [0], [0], [1], [0, 0, 1, 1], [], []>} : vector<58x32xf32>, vector<32x64xf32>, vector<58x64xf32> -> vector<58x64xf32>
    %61 = arith.addf %57, %60 : vector<58x64xf32>
    %c13 = arith.constant 13 : index
    %c0_38 = arith.constant 0 : index
    %62 = vector.load %arg14[%c13, %c0_38] : memref<72x32xf32, #tpu.memory_space<vmem>>, vector<58x32xf32>
    %c224 = arith.constant 224 : index
    %c0_39 = arith.constant 0 : index
    %63 = vector.load %arg6[%c224, %c0_39] : memref<288x64xf32, #tpu.memory_space<vmem>>, vector<32x64xf32>
    %cst_40 = arith.constant dense<0.000000e+00> : vector<58x64xf32>
    %64 = tpu.matmul %62, %63, %cst_40 {dimension_numbers = #tpu.dot_dimension_numbers<[1], [0], [0], [1], [0, 0, 1, 1], [], []>} : vector<58x32xf32>, vector<32x64xf32>, vector<58x64xf32> -> vector<58x64xf32>
    %65 = arith.addf %61, %64 : vector<58x64xf32>
    %c14 = arith.constant 14 : index
    %c0_41 = arith.constant 0 : index
    %66 = vector.load %arg14[%c14, %c0_41] : memref<72x32xf32, #tpu.memory_space<vmem>>, vector<58x32xf32>
    %c256 = arith.constant 256 : index
    %c0_42 = arith.constant 0 : index
    %67 = vector.load %arg6[%c256, %c0_42] : memref<288x64xf32, #tpu.memory_space<vmem>>, vector<32x64xf32>
    %cst_43 = arith.constant dense<0.000000e+00> : vector<58x64xf32>
    %68 = tpu.matmul %66, %67, %cst_43 {dimension_numbers = #tpu.dot_dimension_numbers<[1], [0], [0], [1], [0, 0, 1, 1], [], []>} : vector<58x32xf32>, vector<32x64xf32>, vector<58x64xf32> -> vector<58x64xf32>
    %69 = arith.addf %65, %68 : vector<58x64xf32>
    %c0_44 = arith.constant 0 : index
    %c0_45 = arith.constant 0 : index
    %70 = vector.load %arg2[%c0_44, %c0_45] : memref<58x1xf32, #tpu.memory_space<vmem>>, vector<58x1xf32>
    %71 = vector.broadcast %70 : vector<58x1xf32> to vector<58x64xf32>
    %72 = arith.mulf %69, %71 : vector<58x64xf32>
    %cst_46 = arith.constant dense<0.000000e+00> : vector<64xf32>
    %73 = vector.multi_reduction <add>, %72, %cst_46 [0] : vector<58x64xf32> to vector<64xf32>
    %74 = vector.shape_cast %73 : vector<64xf32> to vector<1x64xf32>
    %cst_47 = arith.constant 3.200000e+01 : f32
    %75 = vector.broadcast %cst_47 : f32 to vector<1x64xf32>
    %76 = arith.divf %74, %75 : vector<1x64xf32>
    %77 = vector.broadcast %76 : vector<1x64xf32> to vector<58x64xf32>
    %78 = arith.subf %69, %77 : vector<58x64xf32>
    %79 = vector.broadcast %70 : vector<58x1xf32> to vector<58x64xf32>
    %80 = arith.mulf %78, %79 : vector<58x64xf32>
    %81 = arith.mulf %80, %80 : vector<58x64xf32>
    %cst_48 = arith.constant dense<0.000000e+00> : vector<64xf32>
    %82 = vector.multi_reduction <add>, %81, %cst_48 [0] : vector<58x64xf32> to vector<64xf32>
    %83 = vector.shape_cast %82 : vector<64xf32> to vector<1x64xf32>
    %cst_49 = arith.constant 3.200000e+01 : f32
    %84 = vector.broadcast %cst_49 : f32 to vector<1x64xf32>
    %85 = arith.divf %83, %84 : vector<1x64xf32>
    %86 = vector.broadcast %76 : vector<1x64xf32> to vector<58x64xf32>
    %87 = arith.subf %69, %86 : vector<58x64xf32>
    %cst_50 = arith.constant 9.99999974E-6 : f32
    %88 = vector.broadcast %cst_50 : f32 to vector<1x64xf32>
    %89 = arith.addf %85, %88 : vector<1x64xf32>
    %90 = math.rsqrt %89 : vector<1x64xf32>
    %91 = vector.broadcast %90 : vector<1x64xf32> to vector<58x64xf32>
    %92 = arith.mulf %87, %91 : vector<58x64xf32>
    %c0_51 = arith.constant 0 : index
    %c0_52 = arith.constant 0 : index
    %93 = vector.load %arg7[%c0_51, %c0_52] : memref<1x64xf32, #tpu.memory_space<vmem>>, vector<1x64xf32>
    %94 = vector.broadcast %93 : vector<1x64xf32> to vector<58x64xf32>
    %95 = arith.mulf %92, %94 : vector<58x64xf32>
    %c0_53 = arith.constant 0 : index
    %c0_54 = arith.constant 0 : index
    %96 = vector.load %arg8[%c0_53, %c0_54] : memref<1x64xf32, #tpu.memory_space<vmem>>, vector<1x64xf32>
    %97 = vector.broadcast %96 : vector<1x64xf32> to vector<58x64xf32>
    %98 = arith.addf %95, %97 : vector<58x64xf32>
    %cst_55 = arith.constant 0.000000e+00 : f32
    %99 = vector.broadcast %cst_55 : f32 to vector<58x64xf32>
    %100 = arith.maximumf %98, %99 : vector<58x64xf32>
    %101 = vector.extract_strided_slice %100 {offsets = [0, 0], sizes = [2, 64], strides = [1, 1]} : vector<58x64xf32> to vector<2x64xf32>
    %102 = vector.extract_strided_slice %100 {offsets = [6, 0], sizes = [2, 64], strides = [1, 1]} : vector<58x64xf32> to vector<2x64xf32>
    %103 = arith.maximumf %101, %102 : vector<2x64xf32>
    %cst_56 = arith.constant dense<0xFF800000> : vector<64xf32>
    %104 = vector.multi_reduction <maximumf>, %103, %cst_56 [0] : vector<2x64xf32> to vector<64xf32>
    %105 = vector.shape_cast %104 : vector<64xf32> to vector<1x64xf32>
    %c0_57 = arith.constant 0 : index
    %c0_58 = arith.constant 0 : index
    %106 = vector.load %arg15[%c0_57, %c0_58] : memref<2x256xf32, #tpu.memory_space<vmem>>, vector<1x64xf32>
    tpu.vector_store %arg15[%c0_57, %c0_58], %105 {strides = array<i32>} : memref<2x256xf32, #tpu.memory_space<vmem>>, vector<1x64xf32>,
    %107 = vector.extract_strided_slice %100 {offsets = [2, 0], sizes = [2, 64], strides = [1, 1]} : vector<58x64xf32> to vector<2x64xf32>
    %108 = vector.extract_strided_slice %100 {offsets = [8, 0], sizes = [2, 64], strides = [1, 1]} : vector<58x64xf32> to vector<2x64xf32>
    %109 = arith.maximumf %107, %108 : vector<2x64xf32>
    %cst_59 = arith.constant dense<0xFF800000> : vector<64xf32>
    %110 = vector.multi_reduction <maximumf>, %109, %cst_59 [0] : vector<2x64xf32> to vector<64xf32>
    %111 = vector.shape_cast %110 : vector<64xf32> to vector<1x64xf32>
    %c0_60 = arith.constant 0 : index
    %c64_61 = arith.constant 64 : index
    %112 = vector.load %arg15[%c0_60, %c64_61] : memref<2x256xf32, #tpu.memory_space<vmem>>, vector<1x64xf32>
    tpu.vector_store %arg15[%c0_60, %c64_61], %111 {strides = array<i32>} : memref<2x256xf32, #tpu.memory_space<vmem>>, vector<1x64xf32>,
    %113 = vector.extract_strided_slice %100 {offsets = [12, 0], sizes = [2, 64], strides = [1, 1]} : vector<58x64xf32> to vector<2x64xf32>
    %114 = vector.extract_strided_slice %100 {offsets = [18, 0], sizes = [2, 64], strides = [1, 1]} : vector<58x64xf32> to vector<2x64xf32>
    %115 = arith.maximumf %113, %114 : vector<2x64xf32>
    %cst_62 = arith.constant dense<0xFF800000> : vector<64xf32>
    %116 = vector.multi_reduction <maximumf>, %115, %cst_62 [0] : vector<2x64xf32> to vector<64xf32>
    %117 = vector.shape_cast %116 : vector<64xf32> to vector<1x64xf32>
    %c0_63 = arith.constant 0 : index
    %c128_64 = arith.constant 128 : index
    %118 = vector.load %arg15[%c0_63, %c128_64] : memref<2x256xf32, #tpu.memory_space<vmem>>, vector<1x64xf32>
    tpu.vector_store %arg15[%c0_63, %c128_64], %117 {strides = array<i32>} : memref<2x256xf32, #tpu.memory_space<vmem>>, vector<1x64xf32>,
    %119 = vector.extract_strided_slice %100 {offsets = [14, 0], sizes = [2, 64], strides = [1, 1]} : vector<58x64xf32> to vector<2x64xf32>
    %120 = vector.extract_strided_slice %100 {offsets = [20, 0], sizes = [2, 64], strides = [1, 1]} : vector<58x64xf32> to vector<2x64xf32>
    %121 = arith.maximumf %119, %120 : vector<2x64xf32>
    %cst_65 = arith.constant dense<0xFF800000> : vector<64xf32>
    %122 = vector.multi_reduction <maximumf>, %121, %cst_65 [0] : vector<2x64xf32> to vector<64xf32>
    %123 = vector.shape_cast %122 : vector<64xf32> to vector<1x64xf32>
    %c0_66 = arith.constant 0 : index
    %c192_67 = arith.constant 192 : index
    %124 = vector.load %arg15[%c0_66, %c192_67] : memref<2x256xf32, #tpu.memory_space<vmem>>, vector<1x64xf32>
    tpu.vector_store %arg15[%c0_66, %c192_67], %123 {strides = array<i32>} : memref<2x256xf32, #tpu.memory_space<vmem>>, vector<1x64xf32>,
    %125 = vector.extract_strided_slice %100 {offsets = [36, 0], sizes = [2, 64], strides = [1, 1]} : vector<58x64xf32> to vector<2x64xf32>
    %126 = vector.extract_strided_slice %100 {offsets = [42, 0], sizes = [2, 64], strides = [1, 1]} : vector<58x64xf32> to vector<2x64xf32>
    %127 = arith.maximumf %125, %126 : vector<2x64xf32>
    %cst_68 = arith.constant dense<0xFF800000> : vector<64xf32>
    %128 = vector.multi_reduction <maximumf>, %127, %cst_68 [0] : vector<2x64xf32> to vector<64xf32>
    %129 = vector.shape_cast %128 : vector<64xf32> to vector<1x64xf32>
    %c1_69 = arith.constant 1 : index
    %c0_70 = arith.constant 0 : index
    %130 = vector.load %arg15[%c1_69, %c0_70] : memref<2x256xf32, #tpu.memory_space<vmem>>, vector<1x64xf32>
    tpu.vector_store %arg15[%c1_69, %c0_70], %129 {strides = array<i32>} : memref<2x256xf32, #tpu.memory_space<vmem>>, vector<1x64xf32>,
    %131 = vector.extract_strided_slice %100 {offsets = [38, 0], sizes = [2, 64], strides = [1, 1]} : vector<58x64xf32> to vector<2x64xf32>
    %132 = vector.extract_strided_slice %100 {offsets = [44, 0], sizes = [2, 64], strides = [1, 1]} : vector<58x64xf32> to vector<2x64xf32>
    %133 = arith.maximumf %131, %132 : vector<2x64xf32>
    %cst_71 = arith.constant dense<0xFF800000> : vector<64xf32>
    %134 = vector.multi_reduction <maximumf>, %133, %cst_71 [0] : vector<2x64xf32> to vector<64xf32>
    %135 = vector.shape_cast %134 : vector<64xf32> to vector<1x64xf32>
    %c1_72 = arith.constant 1 : index
    %c64_73 = arith.constant 64 : index
    %136 = vector.load %arg15[%c1_72, %c64_73] : memref<2x256xf32, #tpu.memory_space<vmem>>, vector<1x64xf32>
    tpu.vector_store %arg15[%c1_72, %c64_73], %135 {strides = array<i32>} : memref<2x256xf32, #tpu.memory_space<vmem>>, vector<1x64xf32>,
    %137 = vector.extract_strided_slice %100 {offsets = [48, 0], sizes = [2, 64], strides = [1, 1]} : vector<58x64xf32> to vector<2x64xf32>
    %138 = vector.extract_strided_slice %100 {offsets = [54, 0], sizes = [2, 64], strides = [1, 1]} : vector<58x64xf32> to vector<2x64xf32>
    %139 = arith.maximumf %137, %138 : vector<2x64xf32>
    %cst_74 = arith.constant dense<0xFF800000> : vector<64xf32>
    %140 = vector.multi_reduction <maximumf>, %139, %cst_74 [0] : vector<2x64xf32> to vector<64xf32>
    %141 = vector.shape_cast %140 : vector<64xf32> to vector<1x64xf32>
    %c1_75 = arith.constant 1 : index
    %c128_76 = arith.constant 128 : index
    %142 = vector.load %arg15[%c1_75, %c128_76] : memref<2x256xf32, #tpu.memory_space<vmem>>, vector<1x64xf32>
    tpu.vector_store %arg15[%c1_75, %c128_76], %141 {strides = array<i32>} : memref<2x256xf32, #tpu.memory_space<vmem>>, vector<1x64xf32>,
    %143 = vector.extract_strided_slice %100 {offsets = [50, 0], sizes = [2, 64], strides = [1, 1]} : vector<58x64xf32> to vector<2x64xf32>
    %144 = vector.extract_strided_slice %100 {offsets = [56, 0], sizes = [2, 64], strides = [1, 1]} : vector<58x64xf32> to vector<2x64xf32>
    %145 = arith.maximumf %143, %144 : vector<2x64xf32>
    %cst_77 = arith.constant dense<0xFF800000> : vector<64xf32>
    %146 = vector.multi_reduction <maximumf>, %145, %cst_77 [0] : vector<2x64xf32> to vector<64xf32>
    %147 = vector.shape_cast %146 : vector<64xf32> to vector<1x64xf32>
    %c1_78 = arith.constant 1 : index
    %c192_79 = arith.constant 192 : index
    %148 = vector.load %arg15[%c1_78, %c192_79] : memref<2x256xf32, #tpu.memory_space<vmem>>, vector<1x64xf32>
    tpu.vector_store %arg15[%c1_78, %c192_79], %147 {strides = array<i32>} : memref<2x256xf32, #tpu.memory_space<vmem>>, vector<1x64xf32>,
    %c0_80 = arith.constant 0 : index
    %c0_81 = arith.constant 0 : index
    %149 = vector.load %arg15[%c0_80, %c0_81] : memref<2x256xf32, #tpu.memory_space<vmem>>, vector<2x256xf32>
    %c0_82 = arith.constant 0 : index
    %c0_83 = arith.constant 0 : index
    %150 = vector.load %arg9[%c0_82, %c0_83] : memref<256x50xf32, #tpu.memory_space<vmem>>, vector<256x50xf32>
    %cst_84 = arith.constant dense<0.000000e+00> : vector<2x50xf32>
    %151 = tpu.matmul %149, %150, %cst_84 {dimension_numbers = #tpu.dot_dimension_numbers<[1], [0], [0], [1], [0, 0, 1, 1], [], []>} : vector<2x256xf32>, vector<256x50xf32>, vector<2x50xf32> -> vector<2x50xf32>
    %c0_85 = arith.constant 0 : index
    %c0_86 = arith.constant 0 : index
    %152 = vector.load %arg10[%c0_85, %c0_86] : memref<1x50xf32, #tpu.memory_space<vmem>>, vector<1x50xf32>
    %153 = vector.broadcast %152 : vector<1x50xf32> to vector<2x50xf32>
    %154 = arith.addf %151, %153 : vector<2x50xf32>
    %cst_87 = arith.constant 0.000000e+00 : f32
    %155 = vector.broadcast %cst_87 : f32 to vector<2x50xf32>
    %156 = arith.maximumf %154, %155 : vector<2x50xf32>
    %c0_88 = arith.constant 0 : index
    %c0_89 = arith.constant 0 : index
    %157 = vector.load %arg11[%c0_88, %c0_89] : memref<50x2xf32, #tpu.memory_space<vmem>>, vector<50x2xf32>
    %cst_90 = arith.constant dense<0.000000e+00> : vector<2x2xf32>
    %158 = tpu.matmul %156, %157, %cst_90 {dimension_numbers = #tpu.dot_dimension_numbers<[1], [0], [0], [1], [0, 0, 1, 1], [], []>} : vector<2x50xf32>, vector<50x2xf32>, vector<2x2xf32> -> vector<2x2xf32>
    %c0_91 = arith.constant 0 : index
    %c0_92 = arith.constant 0 : index
    %159 = vector.load %arg12[%c0_91, %c0_92] : memref<1x2xf32, #tpu.memory_space<vmem>>, vector<1x2xf32>
    %160 = vector.broadcast %159 : vector<1x2xf32> to vector<2x2xf32>
    %161 = arith.addf %158, %160 : vector<2x2xf32>
    %c0_93 = arith.constant 0 : index
    %c0_94 = arith.constant 0 : index
    %162 = vector.load %arg13[%c0_93, %c0_94] : memref<2x2xf32, #tpu.memory_space<vmem>>, vector<2x2xf32>
    tpu.vector_store %arg13[%c0_93, %c0_94], %161 {strides = array<i32>} : memref<2x2xf32, #tpu.memory_space<vmem>>, vector<2x2xf32>,
    return
  }
  func.func @transform_0(%arg0: i32) -> (i32, i32) {
    %c0_i32 = arith.constant 0 : i32
    %c0_i32_0 = arith.constant 0 : i32
    %c0_i32_1 = arith.constant 0 : i32
    return %c0_i32, %c0_i32_0 : i32, i32
  }
  func.func @transform_1(%arg0: i32) -> (i32, i32) {
    %c0_i32 = arith.constant 0 : i32
    %c0_i32_0 = arith.constant 0 : i32
    %c0_i32_1 = arith.constant 0 : i32
    return %c0_i32, %c0_i32_0 : i32, i32
  }
  func.func @transform_2(%arg0: i32) -> (i32, i32) {
    %c0_i32 = arith.constant 0 : i32
    %c0_i32_0 = arith.constant 0 : i32
    %c0_i32_1 = arith.constant 0 : i32
    return %c0_i32, %c0_i32_0 : i32, i32
  }
  func.func @transform_3(%arg0: i32) -> (i32, i32) {
    %c0_i32 = arith.constant 0 : i32
    %c0_i32_0 = arith.constant 0 : i32
    %c0_i32_1 = arith.constant 0 : i32
    return %c0_i32, %c0_i32_0 : i32, i32
  }
  func.func @transform_4(%arg0: i32) -> (i32, i32) {
    %c0_i32 = arith.constant 0 : i32
    %c0_i32_0 = arith.constant 0 : i32
    %c0_i32_1 = arith.constant 0 : i32
    return %c0_i32, %c0_i32_0 : i32, i32
  }
  func.func @transform_5(%arg0: i32) -> (i32, i32) {
    %c0_i32 = arith.constant 0 : i32
    %c0_i32_0 = arith.constant 0 : i32
    %c0_i32_1 = arith.constant 0 : i32
    return %c0_i32, %c0_i32_0 : i32, i32
  }
  func.func @transform_6(%arg0: i32) -> (i32, i32) {
    %c0_i32 = arith.constant 0 : i32
    %c0_i32_0 = arith.constant 0 : i32
    %c0_i32_1 = arith.constant 0 : i32
    return %c0_i32, %c0_i32_0 : i32, i32
  }
  func.func @transform_7(%arg0: i32) -> (i32, i32) {
    %c0_i32 = arith.constant 0 : i32
    %c0_i32_0 = arith.constant 0 : i32
    %c0_i32_1 = arith.constant 0 : i32
    return %c0_i32, %c0_i32_0 : i32, i32
  }
  func.func @transform_8(%arg0: i32) -> (i32, i32) {
    %c0_i32 = arith.constant 0 : i32
    %c0_i32_0 = arith.constant 0 : i32
    %c0_i32_1 = arith.constant 0 : i32
    return %c0_i32, %c0_i32_0 : i32, i32
  }
  func.func @transform_9(%arg0: i32) -> (i32, i32) {
    %c0_i32 = arith.constant 0 : i32
    %c0_i32_0 = arith.constant 0 : i32
    %c0_i32_1 = arith.constant 0 : i32
    return %c0_i32, %c0_i32_0 : i32, i32
  }
  func.func @transform_10(%arg0: i32) -> (i32, i32) {
    %c0_i32 = arith.constant 0 : i32
    %c0_i32_0 = arith.constant 0 : i32
    %c0_i32_1 = arith.constant 0 : i32
    return %c0_i32, %c0_i32_0 : i32, i32
  }
  func.func @transform_11(%arg0: i32) -> (i32, i32) {
    %c0_i32 = arith.constant 0 : i32
    %c0_i32_0 = arith.constant 0 : i32
    %c0_i32_1 = arith.constant 0 : i32
    return %c0_i32, %c0_i32_0 : i32, i32
  }
  func.func @transform_12(%arg0: i32) -> (i32, i32) {
    %c0_i32 = arith.constant 0 : i32
    %c0_i32_0 = arith.constant 0 : i32
    %c0_i32_1 = arith.constant 0 : i32
    return %c0_i32, %c0_i32_0 : i32, i32
  }
}

</mosaic_0001>

<bundles_post_ra>
// kernel: _lambda_.1
= control target key start
LH: loop header
LB: loop body
LE: loop exit
PB: predicated region body
PF: predicated region fallthrough
CT: control target
= control target key end

     0   :  { %vm190_vm0 = vcmask 1041408   ;;  %vm81_vm1 = vcmask 146432   ;;  %s4571_s0 = inlined_call_operand.vmem [shape: f32[288,18], index: 0, kind: input, shape index: {}]   ;;  %s4572_s1 = inlined_call_operand.vmem [shape: f32[58,1], index: 1, kind: input, shape index: {}]   ;;  %s4573_s2 = inlined_call_operand.vmem [shape: f32[18,32], index: 2, kind: input, shape index: {}]   ;;  %s4574_s3 = inlined_call_operand.vmem [shape: f32[1,32], index: 3, kind: input, shape index: {}]   ;;  %s4575_s4 = inlined_call_operand.vmem [shape: f32[1,32], index: 4, kind: input, shape index: {}]   ;;  %s4576_s5 = inlined_call_operand.vmem [shape: f32[288,64], index: 5, kind: input, shape index: {}]   ;;  %s4577_s6 = inlined_call_operand.vmem [shape: f32[1,64], index: 6, kind: input, shape index: {}]   ;;  %s4578_s7 = inlined_call_operand.vmem [shape: f32[1,64], index: 7, kind: input, shape index: {}]   ;;  %s4579_s8 = inlined_call_operand.vmem [shape: f32[256,50], index: 8, kind: input, shape index: {}]   ;;  %s4580_s9 = inlined_call_operand.vmem [shape: f32[1,50], index: 9, kind: input, shape index: {}]   ;;  %s4581_s10 = inlined_call_operand.vmem [shape: f32[50,2], index: 10, kind: input, shape index: {}]   ;;  %s4582_s11 = inlined_call_operand.vmem [shape: f32[1,2], index: 11, kind: input, shape index: {}]   ;;  %s4583_s12 = inlined_call_operand.hbm [shape: f32[2,2], index: 12, kind: output, shape index: {}]  }
   0x1   :  { %v80_v0 = vld [vmem:[%s4573_s2 + $0x10] sm:$0x3]  ;;  %v79_v1 = vld [vmem:[%s4573_s2 + $0x8] sm:$0xff]  ;;  %v42_v2 = vld [vmem:[%s4571_s0] sm:$0xff] }
   0x2   :  { %3035 = vmatprep.subr.msk.mxu0 %vm190_vm0, %v80_v0  ;;  %v78_v3 = vld [vmem:[%s4573_s2] sm:$0xff]  ;;  %3041 = vmatprep.mubr.msk.f32.mxu0 %vm81_vm1, %v42_v2  ;;  %v43_v4 = vld [vmem:[%s4571_s0 + $0x8] sm:$0xff]  ;;  %v44_v5 = vld [vmem:[%s4571_s0 + $0x10] sm:$0xff] }
   0x3   :  { %3036 = vmatpush3.msk.msra.mxu0 %vm190_vm0, %v80_v0  ;;  %v45_v6 = vld [vmem:[%s4571_s0 + $0x18] sm:$0xff]  ;;  %v46_v7 = vld [vmem:[%s4571_s0 + $0x20] sm:$0xff]  ;;  %v47_v8 = vld [vmem:[%s4571_s0 + $0x28] sm:$0xff] }
   0x4   :  { %3037 = vmatprep.subr.mxu0 %v79_v1  ;;  %v48_v9 = vld [vmem:[%s4571_s0 + $0x30] sm:$0xff] }
   0x5   :  { %3038 = vmatpush3.msra.mxu0 %v79_v1 }
   0x6   :  { %3039 = vmatprep.subr.mxu0 %v78_v3 }
   0x7   :  { %3040 = vmatpush3.msra.mxu0 %v78_v3 }
   0x8   :  { %3042 = vmatmul.mubr.msk.f32.vlgmr.msra.gmra.mxu0 %vm81_vm1, %v43_v4 }
   0x9   :  { %3044 = vmatprep.mubr.msk.f32.mxu0 %vm81_vm1, %v44_v5 }
   0xc   :  { %3045 = vmatmul.mubr.msk.f32.gmra.mxu0 %vm81_vm1, %v45_v6 }
   0xd   :  { %3047 = vmatprep.mubr.msk.f32.mxu0 %vm81_vm1, %v46_v7 }
   0xe   :  { %17 = vsyncpa [#allocation5], 0  ;;  %v49_v10 = vld [vmem:[%s4571_s0 + $0x38] sm:$0xff]  ;;  %v50_v11 = vld [vmem:[%s4571_s0 + $0x40] sm:$0xff]  ;;  %vm439_vm2 = vcmask 261120   ;;  %vm2246_vm3 = vcmask 523264  }
   0xf   :  { %v51_v12 = vld [vmem:[%s4571_s0 + $0x48] sm:$0xff]  ;;  %v52_v13 = vld [vmem:[%s4571_s0 + $0x50] sm:$0xff]  ;;  %v53_v14 = vld [vmem:[%s4571_s0 + $0x58] sm:$0xff]  ;;  %vm2260_vm4 = vcmask 517120   ;;  %vm2412_vm5 = vcmask 523270   ;;  %vm2378_vm6 = vcmask 519170  }
  0x10   :  { %3048 = vmatmul.mubr.msk.f32.gmra.mxu0 %vm81_vm1, %v47_v8  ;;  %v54_v15 = vld [vmem:[%s4571_s0 + $0x60] sm:$0xff]  ;;  %v55_v16 = vld [vmem:[%s4571_s0 + $0x68] sm:$0xff]  ;;  %v56_v17 = vld [vmem:[%s4571_s0 + $0x70] sm:$0xff]  ;;  %vm2403_vm7 = vcmask 521220   ;;  %vm2372_vm8 = vcmask 516096   ;;  %s3328_s18 = smov 64  }
  0x11   :  { %3050 = vmatprep.mubr.msk.f32.mxu0 %vm81_vm1, %v48_v9  ;;  %v57_v18 = vld [vmem:[%s4571_s0 + $0x78] sm:$0xff]  ;;  %v58_v19 = vld [vmem:[%s4571_s0 + $0x80] sm:$0xff]  ;;  %v59_v20 = vld [vmem:[%s4571_s0 + $0x88] sm:$0xff]  ;;  %vm2397_vm9 = vcmask 1040896   ;;  %vm3330_vm10 = vmmov 0   ;;  %vm2634_vm11 = vcmask 408576  }
  0x12   :  { %v60_v21 = vld [vmem:[%s4571_s0 + $0x90] sm:$0xff]  ;;  %v61_v22 = vld [vmem:[%s4571_s0 + $0x98] sm:$0xff]  ;;  %v62_v23 = vld [vmem:[%s4571_s0 + $0xa0] sm:$0xff]  ;;  %s3331_s15 = smov [#allocation4]   ;;  %vm2711_vm12 = vcmask 9216  }
  0x13   :  { %v63_v24 = vld [vmem:[%s4571_s0 + $0xa8] sm:$0xff]  ;;  %v64_v25 = vld [vmem:[%s4571_s0 + $0xb0] sm:$0xff]  ;;  %v65_v26 = vld [vmem:[%s4571_s0 + $0xb8] sm:$0xff] }
  0x14   :  { %3051 = vmatmul.mubr.msk.f32.gmra.mxu0 %vm81_vm1, %v49_v10  ;;  %v66_v27 = vld [vmem:[%s4571_s0 + $0xc0] sm:$0xff]  ;;  %v67_v28 = vld [vmem:[%s4571_s0 + $0xc8] sm:$0xff]  ;;  %v68_v29 = vld [vmem:[%s4571_s0 + $0xd0] sm:$0xff] }
  0x15   :  { %3053 = vmatprep.mubr.msk.f32.mxu0 %vm81_vm1, %v50_v11  ;;  %v69_v30 = vld [vmem:[%s4571_s0 + $0xd8] sm:$0xff]  ;;  %v70_v31 = vld [vmem:[%s4571_s0 + $0xe0] sm:$0xff]  ;;  %v71_v32 = vld [vmem:[%s4571_s0 + $0xe8] sm:$0xff] }
  0x16   :  { %v72_v33 = vld [vmem:[%s4571_s0 + $0xf0] sm:$0xff]  ;;  %v73_v34 = vld [vmem:[%s4571_s0 + $0xf8] sm:$0xff]  ;;  %v74_v35 = vld [vmem:[%s4571_s0 + $0x100] sm:$0xff] }
  0x17   :  { %v75_v36 = vld [vmem:[%s4571_s0 + $0x108] sm:$0xff]  ;;  %v76_v37 = vld [vmem:[%s4571_s0 + $0x110] sm:$0xff]  ;;  %v77_v38 = vld [vmem:[%s4571_s0 + $0x118] sm:$0xff] }
  0x18   :  { %3054 = vmatmul.mubr.msk.f32.gmra.mxu0 %vm81_vm1, %v51_v12 }
  0x19   :  { %3056 = vmatprep.mubr.msk.f32.mxu0 %vm81_vm1, %v52_v13 }
  0x1c   :  { %3057 = vmatmul.mubr.msk.f32.gmra.mxu0 %vm81_vm1, %v53_v14 }
  0x1d   :  { %3059 = vmatprep.mubr.msk.f32.mxu0 %vm81_vm1, %v54_v15 }
  0x20   :  { %3060 = vmatmul.mubr.msk.f32.gmra.mxu0 %vm81_vm1, %v55_v16 }
  0x21   :  { %3062 = vmatprep.mubr.msk.f32.mxu0 %vm81_vm1, %v56_v17 }
  0x24   :  { %3063 = vmatmul.mubr.msk.f32.gmra.mxu0 %vm81_vm1, %v57_v18 }
  0x25   :  { %3065 = vmatprep.mubr.msk.f32.mxu0 %vm81_vm1, %v58_v19 }
  0x28   :  { %3066 = vmatmul.mubr.msk.f32.gmra.mxu0 %vm81_vm1, %v59_v20 }
  0x29   :  { %3068 = vmatprep.mubr.msk.f32.mxu0 %vm81_vm1, %v60_v21 }
  0x2c   :  { %3069 = vmatmul.mubr.msk.f32.gmra.mxu0 %vm81_vm1, %v61_v22 }
  0x2d   :  { %3071 = vmatprep.mubr.msk.f32.mxu0 %vm81_vm1, %v62_v23 }
  0x30   :  { %3072 = vmatmul.mubr.msk.f32.gmra.mxu0 %vm81_vm1, %v63_v24 }
  0x31   :  { %3074 = vmatprep.mubr.msk.f32.mxu0 %vm81_vm1, %v64_v25 }
  0x34   :  { %3075 = vmatmul.mubr.msk.f32.gmra.mxu0 %vm81_vm1, %v65_v26 }
  0x35   :  { %3077 = vmatprep.mubr.msk.f32.mxu0 %vm81_vm1, %v66_v27 }
  0x38   :  { %3078 = vmatmul.mubr.msk.f32.gmra.mxu0 %vm81_vm1, %v67_v28 }
  0x39   :  { %3080 = vmatprep.mubr.msk.f32.mxu0 %vm81_vm1, %v68_v29 }
  0x3c   :  { %3081 = vmatmul.mubr.msk.f32.gmra.mxu0 %vm81_vm1, %v69_v30 }
  0x3d   :  { %3083 = vmatprep.mubr.msk.f32.mxu0 %vm81_vm1, %v70_v31 }
  0x40   :  { %3084 = vmatmul.mubr.msk.f32.gmra.mxu0 %vm81_vm1, %v71_v32 }
  0x41   :  { %3086 = vmatprep.mubr.msk.f32.mxu0 %vm81_vm1, %v72_v33 }
  0x44   :  { %3087 = vmatmul.mubr.msk.f32.gmra.mxu0 %vm81_vm1, %v73_v34 }
  0x45   :  { %3089 = vmatprep.mubr.msk.f32.mxu0 %vm81_vm1, %v74_v35 }
  0x48   :  { %3090 = vmatmul.mubr.msk.f32.gmra.mxu0 %vm81_vm1, %v75_v36 }
  0x49   :  { %3092 = vmatprep.mubr.msk.f32.mxu0 %vm81_vm1, %v76_v37 }
  0x4c   :  { %3093 = vmatmul.mubr.msk.f32.gmra.mxu0 %vm81_vm1, %v77_v38 }
  0xc8   :  { %v3552_v39 = vpop.f32.mrf.mxu0 }
  0xc9   :  { %v441_v43 = vsel %vm439_vm2, %v3552_v39, 0.0 }
  0xca   :  { %v3554_v40 = vpop.f32.mrf.mxu0 }
  0xcb   :  { %v440_v41 = vsel %vm439_vm2, %v3554_v40, 0.0 }
  0xcc   :  { %v3558_v42 = vpop.f32.mrf.mxu0  ;;  %v442_v44 = vadd.f32 %v441_v43, %v440_v41 }
  0xcd   :  { %v445_v49 = vsel %vm439_vm2, %v3558_v42, 0.0 }
  0xce   :  { %v3562_v45 = vpop.f32.mrf.mxu0 }
  0xcf   :  { %v443_v46 = vsel %vm439_vm2, %v3562_v45, 0.0 }
  0xd0   :  { %v444_v47 = vadd.f32 %v443_v46, %v442_v44  ;;  %v3566_v48 = vpop.f32.mrf.mxu0 }
  0xd1   :  { %v449_v55 = vsel %vm439_vm2, %v3566_v48, 0.0 }
  0xd2   :  { %v3570_v50 = vpop.f32.mrf.mxu0  ;;  %v446_v51 = vadd.f32 %v445_v49, %v444_v47 }
  0xd3   :  { %v447_v52 = vsel %vm439_vm2, %v3570_v50, 0.0 }
  0xd4   :  { %v448_v53 = vadd.f32 %v447_v52, %v446_v51  ;;  %v3574_v54 = vpop.f32.mrf.mxu0 }
  0xd5   :  { %v453_v61 = vsel %vm439_vm2, %v3574_v54, 0.0 }
  0xd6   :  { %v3578_v56 = vpop.f32.mrf.mxu0  ;;  %v450_v57 = vadd.f32 %v449_v55, %v448_v53 }
  0xd7   :  { %v451_v58 = vsel %vm439_vm2, %v3578_v56, 0.0 }
  0xd8   :  { %v452_v59 = vadd.f32 %v451_v58, %v450_v57  ;;  %v3582_v60 = vpop.f32.mrf.mxu0 }
  0xd9   :  { %v457_v3 = vsel %vm439_vm2, %v3582_v60, 0.0 }
  0xda   :  { %v3586_v62 = vpop.f32.mrf.mxu0  ;;  %v454_v63 = vadd.f32 %v453_v61, %v452_v59 }
  0xdb   :  { %v455_v0 = vsel %vm439_vm2, %v3586_v62, 0.0 }
  0xdc   :  { %v456_v1 = vadd.f32 %v455_v0, %v454_v63  ;;  %v3590_v2 = vpop.f32.mrf.mxu0 }
  0xdd   :  { %v461_v9 = vsel %vm439_vm2, %v3590_v2, 0.0 }
  0xde   :  { %v3594_v4 = vpop.f32.mrf.mxu0  ;;  %v458_v5 = vadd.f32 %v457_v3, %v456_v1 }
  0xdf   :  { %v459_v6 = vsel %vm439_vm2, %v3594_v4, 0.0 }
  0xe0   :  { %v460_v7 = vadd.f32 %v459_v6, %v458_v5  ;;  %v3598_v8 = vpop.f32.mrf.mxu0 }
  0xe1   :  { %v465_v15 = vsel %vm439_vm2, %v3598_v8, 0.0 }
  0xe2   :  { %v3602_v10 = vpop.f32.mrf.mxu0  ;;  %v462_v11 = vadd.f32 %v461_v9, %v460_v7 }
  0xe3   :  { %v463_v12 = vsel %vm439_vm2, %v3602_v10, 0.0 }
  0xe4   :  { %v464_v13 = vadd.f32 %v463_v12, %v462_v11  ;;  %v3606_v14 = vpop.f32.mrf.mxu0 }
  0xe5   :  { %v469_v21 = vsel %vm439_vm2, %v3606_v14, 0.0 }
  0xe6   :  { %v3610_v16 = vpop.f32.mrf.mxu0  ;;  %v466_v17 = vadd.f32 %v465_v15, %v464_v13 }
  0xe7   :  { %v467_v18 = vsel %vm439_vm2, %v3610_v16, 0.0 }
  0xe8   :  { %v468_v19 = vadd.f32 %v467_v18, %v466_v17  ;;  %v3614_v20 = vpop.f32.mrf.mxu0 }
  0xe9   :  { %v473_v27 = vsel %vm439_vm2, %v3614_v20, 0.0 }
  0xea   :  { %v3618_v22 = vpop.f32.mrf.mxu0  ;;  %v470_v23 = vadd.f32 %v469_v21, %v468_v19 }
  0xeb   :  { %v471_v24 = vsel %vm439_vm2, %v3618_v22, 0.0 }
  0xec   :  { %v472_v25 = vadd.f32 %v471_v24, %v470_v23  ;;  %v3622_v26 = vpop.f32.mrf.mxu0 }
  0xed   :  { %v477_v33 = vsel %vm439_vm2, %v3622_v26, 0.0 }
  0xee   :  { %v3626_v28 = vpop.f32.mrf.mxu0  ;;  %v474_v29 = vadd.f32 %v473_v27, %v472_v25 }
  0xef   :  { %v475_v30 = vsel %vm439_vm2, %v3626_v28, 0.0 }
  0xf0   :  { %v476_v31 = vadd.f32 %v475_v30, %v474_v29  ;;  %v3630_v32 = vpop.f32.mrf.mxu0 }
  0xf1   :  { %v481_v41 = vsel %vm439_vm2, %v3630_v32, 0.0 }
  0xf2   :  { %v3634_v34 = vpop.f32.mrf.mxu0  ;;  %v478_v35 = vadd.f32 %v477_v33, %v476_v31 }
  0xf3   :  { %v479_v36 = vsel %vm439_vm2, %v3634_v34, 0.0 }
  0xf4   :  { %v480_v37 = vadd.f32 %v479_v36, %v478_v35  ;;  %v3638_v38 = vpop.f32.mrf.mxu0 }
  0xf5   :  { %v485_v51 = vsel %vm439_vm2, %v3638_v38, 0.0 }
  0xf6   :  { %v3642_v43 = vpop.f32.mrf.mxu0  ;;  %v482_v44 = vadd.f32 %v481_v41, %v480_v37 }
  0xf7   :  { %v483_v46 = vsel %vm439_vm2, %v3642_v43, 0.0 }
  0xf8   :  { %v484_v47 = vadd.f32 %v483_v46, %v482_v44  ;;  %v3646_v49 = vpop.f32.mrf.mxu0 }
  0xf9   :  { %v489_v59 = vsel %vm439_vm2, %v3646_v49, 0.0 }
  0xfa   :  { %v3650_v52 = vpop.f32.mrf.mxu0  ;;  %v486_v53 = vadd.f32 %v485_v51, %v484_v47 }
  0xfb   :  { %v487_v55 = vsel %vm439_vm2, %v3650_v52, 0.0 }
  0xfc   :  { %v488_v57 = vadd.f32 %v487_v55, %v486_v53  ;;  %v3654_v58 = vpop.f32.mrf.mxu0 }
  0xfd   :  { %v493_v5 = vsel %vm439_vm2, %v3654_v58, 0.0 }
  0xfe   :  { %v3658_v61 = vpop.f32.mrf.mxu0  ;;  %v490_v63 = vadd.f32 %v489_v59, %v488_v57 }
  0xff   :  { %v491_v0 = vsel %vm439_vm2, %v3658_v61, 0.0 }
 0x100   :  { %v492_v1 = vadd.f32 %v491_v0, %v490_v63  ;;  %v3662_v3 = vpop.f32.mrf.mxu0 }
 0x101   :  { %v497_v13 = vsel %vm439_vm2, %v3662_v3, 0.0 }
 0x102   :  { %v3666_v6 = vpop.f32.mrf.mxu0  ;;  %v494_v7 = vadd.f32 %v493_v5, %v492_v1 }
 0x103   :  { %v495_v9 = vsel %vm439_vm2, %v3666_v6, 0.0 }
 0x104   :  { %v496_v11 = vadd.f32 %v495_v9, %v494_v7  ;;  %v3670_v12 = vpop.f32.mrf.mxu0 }
 0x105   :  { %v501_v23 = vsel %vm439_vm2, %v3670_v12, 0.0 }
 0x106   :  { %v3674_v15 = vpop.f32.mrf.mxu0  ;;  %v498_v17 = vadd.f32 %v497_v13, %v496_v11 }
 0x107   :  { %v499_v18 = vsel %vm439_vm2, %v3674_v15, 0.0 }
 0x108   :  { %v500_v19 = vadd.f32 %v499_v18, %v498_v17  ;;  %v3091_v21 = vpop.f32.mrf.mxu0 }
 0x109   :  { %v505_v31 = vsel %vm439_vm2, %v3091_v21, 0.0 }
 0x10a   :  { %v3680_v24 = vpop.f32.mrf.mxu0  ;;  %v502_v25 = vadd.f32 %v501_v23, %v500_v19 }
 0x10b   :  { %v503_v27 = vsel %vm439_vm2, %v3680_v24, 0.0 }
 0x10c   :  { %v504_v29 = vadd.f32 %v503_v27, %v502_v25  ;;  %v3094_v30 = vpop.f32.mrf.mxu0 }
 0x10d   :  { %v509_v41 = vsel %vm439_vm2, %v3094_v30, 0.0 }
 0x10e   :  { %v3685_v33 = vpop.f32.mrf.mxu0  ;;  %v506_v35 = vadd.f32 %v505_v31, %v504_v29 }
 0x10f   :  { %v507_v36 = vsel %vm439_vm2, %v3685_v33, 0.0 }
 0x110   :  { %v508_v37 = vadd.f32 %v507_v36, %v506_v35 }
 0x112   :  { %v510_v44 = vadd.f32 %v509_v41, %v508_v37 }
 0x114   :  { %v511_v46 = vrot.slane %v510_v44, 4 }
 0x116   :  { %v512_v47 = vadd.f32 %v511_v46, %v510_v44 }
 0x118   :  { %v513_v51 = vrot.slane %v512_v47, 2 }
 0x11a   :  { %v514_v53 = vadd.f32 %v513_v51, %v512_v47 }
 0x11c   :  { %v515_v55 = vrot.slane %v514_v53, 1 }
 0x11e   :  { %v516_v57 = vadd.f32 %v515_v55, %v514_v53 }
 0x120   :  { %v3690_v59 = vmul.f32 0.0034722222, %v516_v57 }
 0x122   :  { %v3693_v63 = vsub.f32 %v3091_v21, %v3690_v59  ;;  %v3696_v0 = vsub.f32 %v3094_v30, %v3690_v59  ;;  %v3700_v1 = vsub.f32 %v3554_v40, %v3690_v59  ;;  %v3704_v5 = vsub.f32 %v3552_v39, %v3690_v59 }
 0x123   :  { %v3708_v7 = vsub.f32 %v3562_v45, %v3690_v59  ;;  %v3712_v9 = vsub.f32 %v3558_v42, %v3690_v59  ;;  %v3720_v40 = vsub.f32 %v3570_v50, %v3690_v59  ;;  %v3726_v45 = vsub.f32 %v3566_v48, %v3690_v59 }
 0x124   :  { %v555_v11 = vmul.f32 %v3700_v1, %v3700_v1  ;;  %v556_v13 = vmul.f32 %v3704_v5, %v3704_v5  ;;  %v3734_v21 = vsub.f32 %v3578_v56, %v3690_v59  ;;  %v3741_v48 = vsub.f32 %v3574_v54, %v3690_v59 }
 0x125   :  { %v557_v39 = vmul.f32 %v3708_v7, %v3708_v7  ;;  %v558_v42 = vmul.f32 %v3712_v9, %v3712_v9  ;;  %v559_v50 = vmul.f32 %v3720_v40, %v3720_v40  ;;  %v560_v27 = vmul.f32 %v3726_v45, %v3726_v45 }
 0x126   :  { %v591_v17 = vsel %vm439_vm2, %v555_v11, 0.0  ;;  %v592_v18 = vsel %vm439_vm2, %v556_v13, 0.0  ;;  %v3748_v56 = vsub.f32 %v3586_v62, %v3690_v59  ;;  %v561_v31 = vmul.f32 %v3734_v21, %v3734_v21 }
 0x127   :  { %v593_v19 = vadd.f32 %v592_v18, %v591_v17  ;;  %v594_v23 = vsel %vm439_vm2, %v557_v39, 0.0  ;;  %v596_v29 = vsel %vm439_vm2, %v558_v42, 0.0  ;;  %v598_v35 = vsel %vm439_vm2, %v559_v50, 0.0  ;;  %v887_v50 = vld [vmem:[%s4576_s5 + $0x30] sm:$0xff] }
 0x128   :  { %v3755_v54 = vsub.f32 %v3582_v60, %v3690_v59  ;;  %v562_v37 = vmul.f32 %v3741_v48, %v3741_v48  ;;  %v600_v41 = vsel %vm439_vm2, %v560_v27, 0.0  ;;  %v3762_v62 = vsub.f32 %v3594_v4, %v3690_v59  ;;  %v1604_v27 = vld [vmem:[%s4576_s5 + $0xb0] sm:$0xff] }
 0x129   :  { %v595_v25 = vadd.f32 %v594_v23, %v593_v19  ;;  %v563_v46 = vmul.f32 %v3748_v56, %v3748_v56  ;;  %v602_v47 = vsel %vm439_vm2, %v561_v31, 0.0  ;;  %v3769_v60 = vsub.f32 %v3590_v2, %v3690_v59  ;;  %v1605_v19 = vld [vmem:[%s4576_s5 + $0xb8] sm:$0xff] }
 0x12a   :  { %v564_v53 = vmul.f32 %v3755_v54, %v3755_v54  ;;  %v604_v55 = vsel %vm439_vm2, %v562_v37, 0.0  ;;  %v3776_v4 = vsub.f32 %v3602_v10, %v3690_v59  ;;  %v565_v11 = vmul.f32 %v3762_v62, %v3762_v62  ;;  %v888_v10 = vld [vmem:[%s4576_s5 + $0x38] sm:$0xff]  ;;  %3195 = vmatprep.subr.mxu0 %v1605_v19 }
 0x12b   :  { %v597_v30 = vadd.f32 %v596_v29, %v595_v25  ;;  %v606_v13 = vsel %vm439_vm2, %v563_v46, 0.0  ;;  %v3783_v2 = vsub.f32 %v3598_v8, %v3690_v59  ;;  %v566_v42 = vmul.f32 %v3769_v60, %v3769_v60  ;;  %3095 = vmatprep.subr.mxu1 %v888_v10  ;;  %3196 = vmatpush3.msra.mxu0 %v1605_v19 }
 0x12c   :  { %v608_v17 = vsel %vm439_vm2, %v564_v53, 0.0  ;;  %v3799_v8 = vsub.f32 %v3610_v16, %v3690_v59  ;;  %v567_v23 = vmul.f32 %v3776_v4, %v3776_v4  ;;  %v610_v25 = vsel %vm439_vm2, %v565_v11, 0.0  ;;  %3096 = vmatpush3.msra.mxu1 %v888_v10  ;;  %v1603_v16 = vld [vmem:[%s4576_s5 + $0xa8] sm:$0xff]  ;;  %3197 = vmatprep.subr.mxu0 %v1604_v27 }
 0x12d   :  { %v599_v36 = vadd.f32 %v598_v35, %v597_v30  ;;  %v886_v30 = vld [vmem:[%s4576_s5 + $0x28] sm:$0xff]  ;;  %v3815_v31 = vsub.f32 %v3606_v14, %v3690_v59  ;;  %v568_v35 = vmul.f32 %v3783_v2, %v3783_v2  ;;  %3097 = vmatprep.subr.mxu1 %v887_v50  ;;  %3198 = vmatpush3.msra.mxu0 %v1604_v27 }
 0x12e   :  { %3098 = vmatpush3.msra.mxu1 %v887_v50  ;;  %v3828_v14 = vsub.f32 %v3618_v22, %v3690_v59  ;;  %v569_v46 = vmul.f32 %v3799_v8, %v3799_v8  ;;  %3199 = vmatprep.subr.mxu0 %v1603_v16  ;;  %v3835_v53 = vsub.f32 %v3614_v20, %v3690_v59 }
 0x12f   :  { %v601_v44 = vadd.f32 %v600_v41, %v599_v36  ;;  %v612_v36 = vsel %vm439_vm2, %v566_v42, 0.0  ;;  %v885_v41 = vld [vmem:[%s4576_s5 + $0x20] sm:$0xff]  ;;  %3099 = vmatprep.subr.mxu1 %v886_v30  ;;  %3200 = vmatpush3.msra.mxu0 %v1603_v16  ;;  %v616_v22 = vsel %vm439_vm2, %v568_v35, 0.0  ;;  %v3881_v16 = vsub.f32 %v3642_v43, %v3690_v59 }
 0x130   :  { %3100 = vmatpush3.msra.mxu1 %v886_v30  ;;  %v571_v20 = vmul.f32 %v3828_v14, %v3828_v14  ;;  %v3896_v43 = vsub.f32 %v3650_v52, %v3690_v59  ;;  %v3910_v52 = vsub.f32 %v3658_v61, %v3690_v59  ;;  %v3924_v61 = vsub.f32 %v3666_v6, %v3690_v59 }
 0x131   :  { %v603_v51 = vadd.f32 %v602_v47, %v601_v44  ;;  %v1602_v44 = vld [vmem:[%s4576_s5 + $0xa0] sm:$0xff]  ;;  %v614_v47 = vsel %vm439_vm2, %v567_v23, 0.0  ;;  %3101 = vmatprep.subr.mxu1 %v885_v41  ;;  %v3938_v6 = vsub.f32 %v3674_v15, %v3690_v59  ;;  %v3952_v15 = vsub.f32 %v3680_v24, %v3690_v59 }
 0x132   :  { %3201 = vmatprep.subr.mxu0 %v1602_v44  ;;  %3102 = vmatpush3.msra.mxu1 %v885_v41  ;;  %v622_v23 = vsel %vm439_vm2, %v571_v20, 0.0 }
 0x133   :  { %v605_v57 = vadd.f32 %v604_v55, %v603_v51  ;;  %v570_v55 = vmul.f32 %v3815_v31, %v3815_v31  ;;  %3202 = vmatpush3.msra.mxu0 %v1602_v44 }
 0x135   :  { %v607_v39 = vadd.f32 %v606_v13, %v605_v57  ;;  %v3843_v57 = vld [vmem:[%s4576_s5 + $0x18] sm:$0xff]  ;;  %v3847_v13 = vsub.f32 %v3626_v28, %v3690_v59  ;;  %v620_v10 = vsel %vm439_vm2, %v570_v55, 0.0  ;;  %v3862_v28 = vsub.f32 %v3634_v34, %v3690_v59 }
 0x136   :  { %3115 = vmatprep.subr.mxu1 %v3843_v57  ;;  %v3877_v34 = vld [vmem:[%s4576_s5 + $0xf8] sm:$0xff] }
 0x137   :  { %v609_v18 = vadd.f32 %v608_v17, %v607_v39  ;;  %v618_v39 = vsel %vm439_vm2, %v569_v46, 0.0  ;;  %v3855_v17 = vsub.f32 %v3622_v26, %v3690_v59  ;;  %v573_v50 = vmul.f32 %v3847_v13, %v3847_v13  ;;  %3235 = vmatprep.subr.mxu0 %v3877_v34 }
 0x138   :  { %v3869_v26 = vsub.f32 %v3630_v32, %v3690_v59  ;;  %v575_v35 = vmul.f32 %v3862_v28, %v3862_v28 }
 0x139   :  { %v611_v29 = vadd.f32 %v610_v25, %v609_v18  ;;  %v572_v18 = vmul.f32 %v3835_v53, %v3835_v53  ;;  %v574_v27 = vmul.f32 %v3855_v17, %v3855_v17  ;;  %v626_v32 = vsel %vm439_vm2, %v573_v50, 0.0 }
 0x13a   :  { %v576_v41 = vmul.f32 %v3869_v26, %v3869_v26 }
 0x13b   :  { %v613_v37 = vadd.f32 %v612_v36, %v611_v29  ;;  %v624_v29 = vsel %vm439_vm2, %v572_v18, 0.0  ;;  %v628_v44 = vsel %vm439_vm2, %v574_v27, 0.0 }
 0x13d   :  { %v615_v51 = vadd.f32 %v614_v47, %v613_v37  ;;  %v3889_v37 = vsub.f32 %v3638_v38, %v3690_v59  ;;  %v577_v47 = vmul.f32 %v3881_v16, %v3881_v16  ;;  %v3903_v38 = vsub.f32 %v3646_v49, %v3690_v59 }
 0x13e   :  { %v3917_v49 = vsub.f32 %v3654_v58, %v3690_v59  ;;  %v3931_v58 = vsub.f32 %v3662_v3, %v3690_v59  ;;  %v3945_v3 = vsub.f32 %v3670_v12, %v3690_v59 }
 0x13f   :  { %v617_v11 = vadd.f32 %v616_v22, %v615_v51  ;;  %v630_v51 = vsel %vm439_vm2, %v575_v35, 0.0  ;;  %v578_v22 = vmul.f32 %v3889_v37, %v3889_v37 }
 0x140   :  { %v586_v12 = vmul.f32 %v3945_v3, %v3945_v3 }
 0x141   :  { %v619_v42 = vadd.f32 %v618_v39, %v617_v11  ;;  %v632_v11 = vsel %vm439_vm2, %v576_v41, 0.0  ;;  %v579_v39 = vmul.f32 %v3896_v43, %v3896_v43 }
 0x143   :  { %v621_v19 = vadd.f32 %v620_v10, %v619_v42  ;;  %v634_v42 = vsel %vm439_vm2, %v577_v47, 0.0  ;;  %v580_v10 = vmul.f32 %v3903_v38, %v3903_v38 }
 0x145   :  { %v623_v25 = vadd.f32 %v622_v23, %v621_v19  ;;  %v636_v19 = vsel %vm439_vm2, %v578_v22, 0.0  ;;  %v581_v23 = vmul.f32 %v3910_v52, %v3910_v52 }
 0x147   :  { %v625_v30 = vadd.f32 %v624_v29, %v623_v25  ;;  %v638_v25 = vsel %vm439_vm2, %v579_v39, 0.0  ;;  %v582_v29 = vmul.f32 %v3917_v49, %v3917_v49  ;;  %v553_v39 = vsub.f32 %v3685_v33, %v3690_v59 }
 0x149   :  { %v627_v36 = vadd.f32 %v626_v32, %v625_v30  ;;  %v640_v30 = vsel %vm439_vm2, %v580_v10, 0.0  ;;  %v583_v32 = vmul.f32 %v3924_v61, %v3924_v61  ;;  %v588_v10 = vmul.f32 %v3693_v63, %v3693_v63 }
 0x14b   :  { %v629_v46 = vadd.f32 %v628_v44, %v627_v36  ;;  %v642_v36 = vsel %vm439_vm2, %v581_v23, 0.0  ;;  %v584_v44 = vmul.f32 %v3931_v58, %v3931_v58  ;;  %v589_v23 = vmul.f32 %v553_v39, %v553_v39 }
 0x14c   :  { %v656_v33 = vsel %vm439_vm2, %v588_v10, 0.0 }
 0x14d   :  { %v631_v55 = vadd.f32 %v630_v51, %v629_v46  ;;  %v644_v46 = vsel %vm439_vm2, %v582_v29, 0.0  ;;  %v585_v51 = vmul.f32 %v3938_v6, %v3938_v6  ;;  %v590_v29 = vmul.f32 %v3696_v0, %v3696_v0 }
 0x14f   :  { %v633_v20 = vadd.f32 %v632_v11, %v631_v55  ;;  %v646_v55 = vsel %vm439_vm2, %v583_v32, 0.0  ;;  %v648_v11 = vsel %vm439_vm2, %v584_v44, 0.0  ;;  %v650_v24 = vsel %vm439_vm2, %v585_v51, 0.0 }
 0x150   :  { %v660_v32 = vsel %vm439_vm2, %v590_v29, 0.0 }
 0x151   :  { %v635_v18 = vadd.f32 %v634_v42, %v633_v20  ;;  %v587_v42 = vmul.f32 %v3952_v15, %v3952_v15 }
 0x153   :  { %v637_v50 = vadd.f32 %v636_v19, %v635_v18  ;;  %v652_v19 = vsel %vm439_vm2, %v586_v12, 0.0 }
 0x155   :  { %v639_v27 = vadd.f32 %v638_v25, %v637_v50  ;;  %v654_v25 = vsel %vm439_vm2, %v587_v42, 0.0 }
 0x157   :  { %v641_v35 = vadd.f32 %v640_v30, %v639_v27  ;;  %v658_v30 = vsel %vm439_vm2, %v589_v23, 0.0 }
 0x159   :  { %v643_v41 = vadd.f32 %v642_v36, %v641_v35 }
 0x15b   :  { %v645_v47 = vadd.f32 %v644_v46, %v643_v41 }
 0x15d   :  { %v647_v22 = vadd.f32 %v646_v55, %v645_v47 }
 0x15f   :  { %v649_v20 = vadd.f32 %v648_v11, %v647_v22 }
 0x161   :  { %v651_v18 = vadd.f32 %v650_v24, %v649_v20  ;;  %v3977_v20 = vld [vmem:[%s4574_s3] ss:$0 sm:$0xff] }
 0x163   :  { %v653_v50 = vadd.f32 %v652_v19, %v651_v18  ;;  %v3985_v19 = vld [vmem:[%s4575_s4] ss:$0 sm:$0xff] }
 0x165   :  { %v655_v27 = vadd.f32 %v654_v25, %v653_v50 }
 0x167   :  { %v657_v59 = vadd.f32 %v656_v33, %v655_v27 }
 0x169   :  { %v659_v35 = vadd.f32 %v658_v30, %v657_v59 }
 0x16b   :  { %v661_v36 = vadd.f32 %v660_v32, %v659_v35 }
 0x16d   :  { %v662_v41 = vrot.slane %v661_v36, 4 }
 0x16f   :  { %v663_v44 = vadd.f32 %v662_v41, %v661_v36 }
 0x171   :  { %v664_v46 = vrot.slane %v663_v44, 2 }
 0x173   :  { %v665_v47 = vadd.f32 %v664_v46, %v663_v44 }
 0x175   :  { %v666_v51 = vrot.slane %v665_v47, 1 }
 0x177   :  { %v667_v55 = vadd.f32 %v666_v51, %v665_v47 }
 0x179   :  { %v668_v22 = vmul.f32 0.0034722222, %v667_v55 }
 0x17b   :  { %v669_v12 = vadd.f32 1e-05, %v668_v22 }
 0x17d   :  { %3300 = vrsqrt.f32 %v669_v12 }
 0x18a   :  { %v3301_v11 = vpop.eup %3300 }
 0x18b   :  { %v678_v42 = vmul.f32 %v3301_v11, %v3741_v48  ;;  %v687_v24 = vmul.f32 %v3301_v11, %v3828_v14  ;;  %v696_v18 = vmul.f32 %v3301_v11, %v3903_v38  ;;  %v705_v10 = vmul.f32 %v3301_v11, %v553_v39 }
 0x18c   :  { %v671_v50 = vmul.f32 %v3301_v11, %v3700_v1  ;;  %v672_v23 = vmul.f32 %v3301_v11, %v3704_v5  ;;  %v673_v25 = vmul.f32 %v3301_v11, %v3708_v7  ;;  %v674_v27 = vmul.f32 %v3301_v11, %v3712_v9 }
 0x18d   :  { %v721_v48 = vmul.f32 %v3977_v20, %v678_v42  ;;  %v730_v14 = vmul.f32 %v3977_v20, %v687_v24  ;;  %v739_v38 = vmul.f32 %v3977_v20, %v696_v18  ;;  %v748_v39 = vmul.f32 %v3977_v20, %v705_v10 }
 0x18e   :  { %v675_v29 = vmul.f32 %v3301_v11, %v3720_v40  ;;  %v676_v33 = vmul.f32 %v3301_v11, %v3726_v45  ;;  %v677_v1 = vmul.f32 %v3301_v11, %v3734_v21  ;;  %v679_v5 = vmul.f32 %v3301_v11, %v3748_v56 }
 0x18f   :  { %v764_v7 = vadd.f32 %v3985_v19, %v721_v48  ;;  %v773_v9 = vadd.f32 %v3985_v19, %v730_v14  ;;  %v782_v59 = vadd.f32 %v3985_v19, %v739_v38  ;;  %v791_v30 = vadd.f32 %v3985_v19, %v748_v39 }
 0x190   :  { %v680_v35 = vmul.f32 %v3301_v11, %v3755_v54  ;;  %v681_v32 = vmul.f32 %v3301_v11, %v3762_v62  ;;  %v682_v40 = vmul.f32 %v3301_v11, %v3769_v60  ;;  %v683_v45 = vmul.f32 %v3301_v11, %v3776_v4 }
 0x191   :  { %v800_v36 = vmax.f32 %v764_v7, 0.0  ;;  %v809_v21 = vmax.f32 %v773_v9, 0.0  ;;  %v818_v41 = vmax.f32 %v782_v59, 0.0  ;;  %v827_v56 = vmax.f32 %v791_v30, 0.0 }
 0x192   :  { %v684_v44 = vmul.f32 %v3301_v11, %v3783_v2  ;;  %v685_v46 = vmul.f32 %v3301_v11, %v3799_v8  ;;  %v686_v47 = vmul.f32 %v3301_v11, %v3815_v31  ;;  %v688_v51 = vmul.f32 %v3301_v11, %v3835_v53 }
 0x193   :  { %v836_v55 = vmax.f32 %v800_v36, %v809_v21  ;;  %v845_v54 = vmax.f32 %v818_v41, %v827_v56  ;;  %v689_v62 = vmul.f32 %v3301_v11, %v3847_v13  ;;  %v690_v60 = vmul.f32 %v3301_v11, %v3855_v17 }
 0x194   :  { %v691_v4 = vmul.f32 %v3301_v11, %v3862_v28  ;;  %v692_v22 = vmul.f32 %v3301_v11, %v3869_v26  ;;  %v693_v12 = vmul.f32 %v3301_v11, %v3881_v16  ;;  %v694_v2 = vmul.f32 %v3301_v11, %v3889_v37 }
 0x195   :  { %v854_v42 = vmax.f32 %v836_v55, %v845_v54  ;;  %v695_v8 = vmul.f32 %v3301_v11, %v3896_v43  ;;  %v697_v31 = vmul.f32 %v3301_v11, %v3910_v52  ;;  %v698_v53 = vmul.f32 %v3301_v11, %v3917_v49 }
 0x196   :  { %v699_v24 = vmul.f32 %v3301_v11, %v3924_v61  ;;  %v700_v13 = vmul.f32 %v3301_v11, %v3931_v58  ;;  %v701_v17 = vmul.f32 %v3301_v11, %v3938_v6  ;;  %v702_v28 = vmul.f32 %v3301_v11, %v3945_v3 }
 0x197   :  { %863 = vst.msk [vmem:[#allocation2 + $0x38] sm:$0xff] %vm439_vm2, %v854_v42  ;;  %v703_v26 = vmul.f32 %v3301_v11, %v3952_v15  ;;  %v704_v16 = vmul.f32 %v3301_v11, %v3693_v63  ;;  %v706_v37 = vmul.f32 %v3301_v11, %v3696_v0  ;;  %v714_v43 = vmul.f32 %v3977_v20, %v671_v50 }
 0x198   :  { %v715_v52 = vmul.f32 %v3977_v20, %v672_v23  ;;  %v716_v49 = vmul.f32 %v3977_v20, %v673_v25  ;;  %v717_v61 = vmul.f32 %v3977_v20, %v674_v27  ;;  %v718_v58 = vmul.f32 %v3977_v20, %v675_v29 }
 0x199   :  { %v719_v6 = vmul.f32 %v3977_v20, %v676_v33  ;;  %v720_v3 = vmul.f32 %v3977_v20, %v677_v1  ;;  %v722_v15 = vmul.f32 %v3977_v20, %v679_v5  ;;  %v723_v63 = vmul.f32 %v3977_v20, %v680_v35 }
 0x19a   :  { %v724_v0 = vmul.f32 %v3977_v20, %v681_v32  ;;  %v725_v11 = vmul.f32 %v3977_v20, %v682_v40  ;;  %v726_v18 = vmul.f32 %v3977_v20, %v683_v45  ;;  %v727_v10 = vmul.f32 %v3977_v20, %v684_v44 }
 0x19b   :  { %v728_v50 = vmul.f32 %v3977_v20, %v685_v46  ;;  %v729_v23 = vmul.f32 %v3977_v20, %v686_v47  ;;  %v731_v25 = vmul.f32 %v3977_v20, %v688_v51  ;;  %v732_v27 = vmul.f32 %v3977_v20, %v689_v62 }
 0x19c   :  { %v733_v48 = vmul.f32 %v3977_v20, %v690_v60  ;;  %v734_v14 = vmul.f32 %v3977_v20, %v691_v4  ;;  %v735_v38 = vmul.f32 %v3977_v20, %v692_v22  ;;  %v736_v39 = vmul.f32 %v3977_v20, %v693_v12 }
 0x19d   :  { %v737_v29 = vmul.f32 %v3977_v20, %v694_v2  ;;  %v738_v33 = vmul.f32 %v3977_v20, %v695_v8  ;;  %v740_v1 = vmul.f32 %v3977_v20, %v697_v31  ;;  %v741_v5 = vmul.f32 %v3977_v20, %v698_v53 }
 0x19e   :  { %v742_v7 = vmul.f32 %v3977_v20, %v699_v24  ;;  %v743_v9 = vmul.f32 %v3977_v20, %v700_v13  ;;  %v744_v59 = vmul.f32 %v3977_v20, %v701_v17  ;;  %v745_v30 = vmul.f32 %v3977_v20, %v702_v28 }
 0x19f   :  { %v746_v35 = vmul.f32 %v3977_v20, %v703_v26  ;;  %v747_v32 = vmul.f32 %v3977_v20, %v704_v16  ;;  %v749_v40 = vmul.f32 %v3977_v20, %v706_v37  ;;  %v4061_v45 = vadd.f32 %v3985_v19, %v714_v43 }
 0x1a0   :  { %v4064_v36 = vadd.f32 %v3985_v19, %v715_v52  ;;  %v4067_v21 = vadd.f32 %v3985_v19, %v716_v49  ;;  %v4070_v41 = vadd.f32 %v3985_v19, %v717_v61  ;;  %v4073_v56 = vadd.f32 %v3985_v19, %v718_v58 }
 0x1a1   :  { %v4076_v44 = vadd.f32 %v3985_v19, %v719_v6  ;;  %v4079_v20 = vadd.f32 %v3985_v19, %v720_v3  ;;  %v4082_v46 = vadd.f32 %v3985_v19, %v722_v15  ;;  %v766_v47 = vadd.f32 %v3985_v19, %v723_v63 }
 0x1a2   :  { %v767_v51 = vadd.f32 %v3985_v19, %v724_v0  ;;  %v768_v55 = vadd.f32 %v3985_v19, %v725_v11  ;;  %v769_v54 = vadd.f32 %v3985_v19, %v726_v18  ;;  %v770_v62 = vadd.f32 %v3985_v19, %v727_v10 }
 0x1a3   :  { %v771_v60 = vadd.f32 %v3985_v19, %v728_v50  ;;  %v772_v4 = vadd.f32 %v3985_v19, %v729_v23  ;;  %v774_v22 = vadd.f32 %v3985_v19, %v731_v25  ;;  %v775_v12 = vadd.f32 %v3985_v19, %v732_v27 }
 0x1a4   :  { %v776_v2 = vadd.f32 %v3985_v19, %v733_v48  ;;  %v777_v42 = vadd.f32 %v3985_v19, %v734_v14  ;;  %v778_v8 = vadd.f32 %v3985_v19, %v735_v38  ;;  %v779_v31 = vadd.f32 %v3985_v19, %v736_v39 }
 0x1a5   :  { %v780_v53 = vadd.f32 %v3985_v19, %v737_v29  ;;  %v781_v24 = vadd.f32 %v3985_v19, %v738_v33  ;;  %v783_v13 = vadd.f32 %v3985_v19, %v740_v1  ;;  %v784_v17 = vadd.f32 %v3985_v19, %v741_v5 }
 0x1a6   :  { %v785_v28 = vadd.f32 %v3985_v19, %v742_v7  ;;  %v786_v26 = vadd.f32 %v3985_v19, %v743_v9  ;;  %v787_v16 = vadd.f32 %v3985_v19, %v744_v59  ;;  %v788_v37 = vadd.f32 %v3985_v19, %v745_v30 }
 0x1a7   :  { %v789_v43 = vadd.f32 %v3985_v19, %v746_v35  ;;  %v790_v52 = vadd.f32 %v3985_v19, %v747_v32  ;;  %v792_v49 = vadd.f32 %v3985_v19, %v749_v40  ;;  %v793_v61 = vmax.f32 %v4061_v45, 0.0 }
 0x1a8   :  { %v794_v58 = vmax.f32 %v4064_v36, 0.0  ;;  %v795_v6 = vmax.f32 %v4067_v21, 0.0  ;;  %v796_v3 = vmax.f32 %v4070_v41, 0.0  ;;  %v797_v15 = vmax.f32 %v4073_v56, 0.0 }
 0x1a9   :  { %v798_v63 = vmax.f32 %v4076_v44, 0.0  ;;  %v799_v0 = vmax.f32 %v4079_v20, 0.0  ;;  %v801_v11 = vmax.f32 %v4082_v46, 0.0  ;;  %v802_v18 = vmax.f32 %v766_v47, 0.0 }
 0x1aa   :  { %v803_v10 = vmax.f32 %v767_v51, 0.0  ;;  %v804_v50 = vmax.f32 %v768_v55, 0.0  ;;  %v805_v19 = vmax.f32 %v769_v54, 0.0  ;;  %v806_v23 = vmax.f32 %v770_v62, 0.0 }
 0x1ab   :  { %v807_v25 = vmax.f32 %v771_v60, 0.0  ;;  %v808_v27 = vmax.f32 %v772_v4, 0.0  ;;  %v810_v48 = vmax.f32 %v774_v22, 0.0  ;;  %v811_v14 = vmax.f32 %v775_v12, 0.0 }
 0x1ac   :  { %v812_v38 = vmax.f32 %v776_v2, 0.0  ;;  %v813_v39 = vmax.f32 %v777_v42, 0.0  ;;  %v814_v29 = vmax.f32 %v778_v8, 0.0  ;;  %v815_v33 = vmax.f32 %v779_v31, 0.0 }
 0x1ad   :  { %v816_v1 = vmax.f32 %v780_v53, 0.0  ;;  %v817_v5 = vmax.f32 %v781_v24, 0.0  ;;  %v819_v7 = vmax.f32 %v783_v13, 0.0  ;;  %v820_v9 = vmax.f32 %v784_v17, 0.0  ;;  %v2190_v13 = vld [vmem:[%s4572_s1] sm:$0xff]  ;;  %v2192_v17 = vld [vmem:[%s4572_s1 + $0x10] sm:$0xff] }
 0x1ae   :  { %v821_v59 = vmax.f32 %v785_v28, 0.0  ;;  %v822_v30 = vmax.f32 %v786_v26, 0.0  ;;  %v823_v35 = vmax.f32 %v787_v16, 0.0  ;;  %v824_v32 = vmax.f32 %v788_v37, 0.0 }
 0x1af   :  { %v825_v40 = vmax.f32 %v789_v43, 0.0  ;;  %v826_v45 = vmax.f32 %v790_v52, 0.0  ;;  %v828_v36 = vmax.f32 %v792_v49, 0.0  ;;  %v829_v21 = vmax.f32 %v793_v61, %v802_v18  ;;  %v2191_v43 = vld [vmem:[%s4572_s1 + $0x8] sm:$0xff]  ;;  %v2193_v52 = vld [vmem:[%s4572_s1 + $0x18] sm:$0xff] }
 0x1b0   :  { %v830_v41 = vmax.f32 %v794_v58, %v803_v10  ;;  %v831_v56 = vmax.f32 %v795_v6, %v804_v50  ;;  %v832_v44 = vmax.f32 %v796_v3, %v805_v19  ;;  %v833_v20 = vmax.f32 %v797_v15, %v806_v23  ;;  %v875_v3 = vld [vmem:[%s4576_s5 + $0x10] sm:$0xff] }
 0x1b1   :  { %v834_v46 = vmax.f32 %v798_v63, %v807_v25  ;;  %v835_v47 = vmax.f32 %v799_v0, %v808_v27  ;;  %v837_v51 = vmax.f32 %v801_v11, %v810_v48  ;;  %v838_v55 = vmax.f32 %v811_v14, %v820_v9  ;;  %v874_v0 = vld [vmem:[%s4576_s5 + $0x8] sm:$0xff]  ;;  %v1600_v48 = vld [vmem:[#allocation2 + $0x38] sm:$0xff]  ;;  %v1900_v14 = vld [vmem:[%s4576_s5 + $0xe0] sm:$0xff] }
 0x1b2   :  { %v839_v54 = vmax.f32 %v812_v38, %v821_v59  ;;  %v840_v62 = vmax.f32 %v813_v39, %v822_v30  ;;  %v841_v60 = vmax.f32 %v814_v29, %v823_v35  ;;  %v842_v4 = vmax.f32 %v815_v33, %v824_v32  ;;  %v1901_v25 = vld [vmem:[%s4576_s5 + $0xe8] sm:$0xff]  ;;  %v884_v38 = vld [vmem:[#allocation2 + $0x39] sm:$0x3]  ;;  %v1157_v9 = vld [vmem:[%s4576_s5 + $0x50] sm:$0xff] }
 0x1b3   :  { %v843_v22 = vmax.f32 %v816_v1, %v825_v40  ;;  %v844_v12 = vmax.f32 %v817_v5, %v826_v45  ;;  %v846_v2 = vmax.f32 %v819_v7, %v828_v36  ;;  %v847_v42 = vmax.f32 %v829_v21, %v838_v55  ;;  %v1158_v29 = vld [vmem:[%s4576_s5 + $0x58] sm:$0xff]  ;;  %v2194_v5 = vld [vmem:[%s4572_s1 + $0x20] sm:$0xff]  ;;  %v2195_v59 = vld [vmem:[%s4572_s1 + $0x28] sm:$0xff] }
 0x1b4   :  { %v848_v8 = vmax.f32 %v830_v41, %v839_v54  ;;  %v849_v31 = vmax.f32 %v831_v56, %v840_v62  ;;  %v850_v53 = vmax.f32 %v832_v44, %v841_v60  ;;  %v851_v24 = vmax.f32 %v833_v20, %v842_v4  ;;  %v1156_v32 = vld [vmem:[%s4576_s5 + $0x48] sm:$0xff]  ;;  %v2196_v40 = vld [vmem:[%s4572_s1 + $0x30] sm:$0xff]  ;;  %v2197_v36 = vld [vmem:[%s4572_s1 + $0x38] sm:$0x3] }
 0x1b5   :  { %v852_v28 = vmax.f32 %v834_v46, %v843_v22  ;;  %v853_v26 = vmax.f32 %v835_v47, %v844_v12  ;;  %v855_v16 = vmax.f32 %v837_v51, %v846_v2  ;;  %856 = vst.msk [vmem:[#allocation2] sm:$0xff] %vm439_vm2, %v847_v42  ;;  %v3326_v37 = vmov 0   ;;  %v1155_v41 = vld [vmem:[%s4576_s5 + $0x40] sm:$0xff]  ;;  %v1307_v44 = vld [vmem:[%s4576_s5 + $0x78] sm:$0xff]  ;;  %v1306_v55 = vld [vmem:[%s4576_s5 + $0x70] sm:$0xff] }
 0x1b6   :  { %857 = vst.msk [vmem:[#allocation2 + $0x8] sm:$0xff] %vm439_vm2, %v848_v8  ;;  %858 = vst.msk [vmem:[#allocation2 + $0x10] sm:$0xff] %vm439_vm2, %v849_v31  ;;  %3298 = vset.pattern.permute.xlu0 %v3326_v37  ;;  %3299 = vset.pattern.permute.xlu1 %v3326_v37  ;;  %v872_v20 = vld [vmem:[#allocation2 + $0x38] sm:$0x3]  ;;  %v1305_v62 = vld [vmem:[%s4576_s5 + $0x68] sm:$0xff] }
 0x1b7   :  { %859 = vst.msk [vmem:[#allocation2 + $0x18] sm:$0xff] %vm439_vm2, %v850_v53  ;;  %860 = vst.msk [vmem:[#allocation2 + $0x20] sm:$0xff] %vm439_vm2, %v851_v24  ;;  %2200 = vperm.xlu0 %3298, %v2190_v13   ;;  %2210 = vperm.xlu1 %3299, %v2192_v17   ;;  %v1304_v4 = vld [vmem:[%s4576_s5 + $0x60] sm:$0xff]  ;;  %v1456_v12 = vld [vmem:[%s4576_s5 + $0x98] sm:$0xff] }
 0x1b8   :  { %861 = vst.msk [vmem:[#allocation2 + $0x28] sm:$0xff] %vm439_vm2, %v852_v28  ;;  %862 = vst.msk [vmem:[#allocation2 + $0x30] sm:$0xff] %vm439_vm2, %v853_v26  ;;  %v1154_v8 = vld [vmem:[#allocation2 + $0x3a] sm:$0x3]  ;;  %v1455_v24 = vld [vmem:[%s4576_s5 + $0x90] sm:$0xff] }
 0x1b9   :  { %864 = vst.msk [vmem:[#allocation2 + $0x40] sm:$0xff] %vm439_vm2, %v855_v16  ;;  %v1454_v17 = vld [vmem:[%s4576_s5 + $0x88] sm:$0xff]  ;;  %v1453_v26 = vld [vmem:[%s4576_s5 + $0x80] sm:$0xff]  ;;  %v1754_v37 = vld [vmem:[%s4576_s5 + $0xd8] sm:$0xff] }
 0x1bb   :  { %2205 = vperm.xlu0 %3298, %v2191_v43   ;;  %2215 = vperm.xlu1 %3299, %v2193_v52  }
 0x1bc   :  { %v865_v33 = vld [vmem:[#allocation2] sm:$0xff] }
 0x1bd   :  { %v877_v49 = vld [vmem:[#allocation2 + $0x1] sm:$0xff]  ;;  %v878_v58 = vld [vmem:[#allocation2 + $0x9] sm:$0xff] }
 0x1be   :  { %v1594_v61 = vld [vmem:[#allocation2 + $0x8] sm:$0xff]  ;;  %3103 = vmatprep.mubr.msk.f32.mxu1 %vm439_vm2, %v877_v49  ;;  %v1595_v6 = vld [vmem:[#allocation2 + $0x10] sm:$0xff]  ;;  %v4145_v63 = vld [vmem:[#allocation2 + $0x18] sm:$0xff] }
 0x1bf   :  { %3203 = vmatprep.mubr.msk.f32.mxu0 %vm439_vm2, %v1594_v61  ;;  %3104 = vmatmul.mubr.msk.f32.vlgmr.msra.gmra.mxu1 %vm439_vm2, %v878_v58  ;;  %v879_v15 = vld [vmem:[#allocation2 + $0x11] sm:$0xff]  ;;  %v880_v11 = vld [vmem:[#allocation2 + $0x19] sm:$0xff]  ;;  %v881_v10 = vld [vmem:[#allocation2 + $0x21] sm:$0xff] }
 0x1c0   :  { %3204 = vmatmul.mubr.msk.f32.vlgmr.msra.gmra.mxu0 %vm439_vm2, %v1595_v6  ;;  %3116 = vmatpush3.msra.mxu1 %v3843_v57  ;;  %v1597_v18 = vld [vmem:[#allocation2 + $0x20] sm:$0xff]  ;;  %v1902_v57 = vld [vmem:[%s4576_s5 + $0xf0] sm:$0xff]  ;;  %v4158_v50 = vld [vmem:[#allocation2 + $0x28] sm:$0xff] }
 0x1c1   :  { %3106 = vmatprep.mubr.msk.f32.mxu1 %vm439_vm2, %v879_v15  ;;  %3206 = vmatprep.mubr.msk.f32.mxu0 %vm439_vm2, %v4145_v63  ;;  %v882_v19 = vld [vmem:[#allocation2 + $0x29] sm:$0xff]  ;;  %v883_v27 = vld [vmem:[#allocation2 + $0x31] sm:$0xff]  ;;  %v1601_v39 = vld [vmem:[#allocation2 + $0x40] sm:$0x3] }
 0x1c2   :  { %3117 = vmatprep.subr.mxu1 %v875_v3  ;;  %3236 = vmatpush3.msra.mxu0 %v3877_v34  ;;  %v873_v34 = vld [vmem:[%s4576_s5] sm:$0xff]  ;;  %v1599_v23 = vld [vmem:[#allocation2 + $0x30] sm:$0xff]  ;;  %v1303_v49 = vld [vmem:[#allocation2 + $0x3e] sm:$0x3] }
 0x1c3   :  { %3118 = vmatpush3.msra.mxu1 %v875_v3  ;;  %3237 = vmatprep.subr.mxu0 %v1902_v57  ;;  %v1892_v1 = vld [vmem:[#allocation2 + $0xd] sm:$0xff]  ;;  %v1893_v7 = vld [vmem:[#allocation2 + $0x15] sm:$0xff]  ;;  %v1894_v30 = vld [vmem:[#allocation2 + $0x1d] sm:$0xff] }
 0x1c4   :  { %3107 = vmatmul.mubr.msk.f32.gmra.mxu1 %vm439_vm2, %v880_v11  ;;  %3207 = vmatmul.mubr.msk.f32.gmra.mxu0 %vm439_vm2, %v1597_v18  ;;  %v1895_v35 = vld [vmem:[#allocation2 + $0x25] sm:$0xff]  ;;  %v1896_v45 = vld [vmem:[#allocation2 + $0x2d] sm:$0xff]  ;;  %v1897_v21 = vld [vmem:[#allocation2 + $0x35] sm:$0xff] }
 0x1c5   :  { %3109 = vmatprep.mubr.msk.f32.mxu1 %vm439_vm2, %v881_v10  ;;  %3209 = vmatprep.mubr.msk.f32.mxu0 %vm439_vm2, %v4158_v50  ;;  %v1898_v56 = vld [vmem:[#allocation2 + $0x3d] sm:$0xff]  ;;  %v1899_v46 = vld [vmem:[#allocation2 + $0x45] sm:$0x3]  ;;  %v1148_v51 = vld [vmem:[#allocation2 + $0xa] sm:$0xff] }
 0x1c6   :  { %3119 = vmatprep.subr.mxu1 %v874_v0  ;;  %3238 = vmatpush3.msra.mxu0 %v1902_v57  ;;  %v1147_v47 = vld [vmem:[#allocation2 + $0x2] sm:$0xff]  ;;  %v1149_v54 = vld [vmem:[#allocation2 + $0x12] sm:$0xff]  ;;  %v1150_v60 = vld [vmem:[#allocation2 + $0x1a] sm:$0xff] }
 0x1c7   :  { %3120 = vmatpush3.msra.mxu1 %v874_v0  ;;  %3239 = vmatprep.subr.mxu0 %v1901_v25  ;;  %v1151_v22 = vld [vmem:[#allocation2 + $0x22] sm:$0xff]  ;;  %v1152_v2 = vld [vmem:[#allocation2 + $0x2a] sm:$0xff]  ;;  %v1153_v42 = vld [vmem:[#allocation2 + $0x32] sm:$0xff] }
 0x1c8   :  { %3110 = vmatmul.mubr.msk.f32.gmra.mxu1 %vm439_vm2, %v882_v19  ;;  %3210 = vmatmul.mubr.msk.f32.gmra.mxu0 %vm439_vm2, %v1599_v23  ;;  %v1296_v31 = vld [vmem:[#allocation2 + $0x6] sm:$0xff]  ;;  %v4244_v53 = vld [vmem:[#allocation2 + $0xe] sm:$0xff]  ;;  %v4251_v13 = vld [vmem:[#allocation2 + $0x16] sm:$0xff] }
 0x1c9   :  { %3112 = vmatprep.mubr.msk.f32.mxu1 %vm439_vm2, %v883_v27  ;;  %3212 = vmatprep.mubr.msk.f32.mxu0 %vm439_vm2, %v1600_v48  ;;  %v4258_v28 = vld [vmem:[#allocation2 + $0x1e] sm:$0xff]  ;;  %v4265_v16 = vld [vmem:[#allocation2 + $0x26] sm:$0xff]  ;;  %v4272_v43 = vld [vmem:[#allocation2 + $0x2e] sm:$0xff] }
 0x1ca   :  { %3121 = vmatprep.subr.mxu1 %v873_v34  ;;  %3240 = vmatpush3.msra.mxu0 %v1901_v25  ;;  %v4276_v52 = vld [vmem:[#allocation2 + $0x36] sm:$0xff]  ;;  %v1752_v15 = vld [vmem:[%s4576_s5 + $0xc8] sm:$0xff]  ;;  %v1751_v0 = vld [vmem:[%s4576_s5 + $0xc0] sm:$0xff] }
 0x1cb   :  { %3122 = vmatpush3.msra.mxu1 %v873_v34  ;;  %3241 = vmatprep.subr.mxu0 %v1900_v14  ;;  %v1446_v58 = vld [vmem:[#allocation2 + $0xf] sm:$0xff]  ;;  %v1447_v3 = vld [vmem:[#allocation2 + $0x17] sm:$0xff]  ;;  %v1449_v11 = vld [vmem:[#allocation2 + $0x27] sm:$0xff] }
 0x1cc   :  { %3113 = vmatmul.mubr.msk.f32.gmra.mxu1 %vm439_vm2, %v884_v38  ;;  %3213 = vmatmul.mubr.msk.f32.gmra.mxu0 %vm439_vm2, %v1601_v39  ;;  %v1450_v57 = vld [vmem:[#allocation2 + $0x2f] sm:$0xff]  ;;  %v1451_v10 = vld [vmem:[#allocation2 + $0x37] sm:$0xff]  ;;  %v1746_v48 = vld [vmem:[#allocation2 + $0x24] sm:$0xff] }
 0x1cd   :  { %3123 = vmatprep.mubr.msk.f32.mxu1 %vm439_vm2, %v865_v33  ;;  %3243 = vmatprep.mubr.msk.f32.mxu0 %vm439_vm2, %v1892_v1  ;;  %v1743_v34 = vld [vmem:[#allocation2 + $0xc] sm:$0xff]  ;;  %v1744_v19 = vld [vmem:[#allocation2 + $0x14] sm:$0xff]  ;;  %v1745_v25 = vld [vmem:[#allocation2 + $0x1c] sm:$0xff] }
 0x1ce   :  { %3135 = vmatprep.subr.mxu1 %v1158_v29  ;;  %3242 = vmatpush3.msra.mxu0 %v1900_v14  ;;  %v2050_v27 = vld [vmem:[%s4576_s5 + $0x108] sm:$0xff]  ;;  %v2049_v14 = vld [vmem:[%s4576_s5 + $0x100] sm:$0xff]  ;;  %v1748_v39 = vld [vmem:[#allocation2 + $0x34] sm:$0xff] }
 0x1cf   :  { %2220 = vperm.xlu0 %3298, %v2194_v5   ;;  %2225 = vperm.xlu1 %3299, %v2195_v59   ;;  %v1747_v38 = vld [vmem:[#allocation2 + $0x2c] sm:$0xff]  ;;  %v1750_v33 = vld [vmem:[#allocation2 + $0x44] sm:$0x3]  ;;  %v2048_v5 = vld [vmem:[#allocation2 + $0x46] sm:$0x3] }
 0x1d0   :  { %3124 = vmatmul.mubr.msk.f32.vlgmr.msra.gmra.mxu1 %vm439_vm2, %v1594_v61  ;;  %3244 = vmatmul.mubr.msk.f32.vlgmr.msra.gmra.mxu0 %vm439_vm2, %v1893_v7  ;;  %v1445_v61 = vld [vmem:[#allocation2 + $0x7] sm:$0xff]  ;;  %v2047_v1 = vld [vmem:[#allocation2 + $0x3e] sm:$0xff] }
 0x1d1   :  { %3136 = vmatpush3.msra.mxu1 %v1158_v29  ;;  %3126 = vmatprep.mubr.msk.f32.mxu1 %vm439_vm2, %v1595_v6  ;;  %v1753_v6 = vld [vmem:[%s4576_s5 + $0xd0] sm:$0xff]  ;;  %v1749_v29 = vld [vmem:[#allocation2 + $0x3c] sm:$0xff] }
 0x1d2   :  { %3246 = vmatprep.mubr.msk.f32.mxu0 %vm439_vm2, %v1894_v30  ;;  %3137 = vmatprep.subr.mxu1 %v1157_v9 }
 0x1d3   :  { %3138 = vmatpush3.msra.mxu1 %v1157_v9  ;;  %2230 = vperm.xlu0 %3298, %v2196_v40  }
 0x1d4   :  { %3127 = vmatmul.mubr.msk.f32.gmra.mxu1 %vm439_vm2, %v4145_v63  ;;  %3247 = vmatmul.mubr.msk.f32.gmra.mxu0 %vm439_vm2, %v1895_v35  ;;  %v1448_v63 = vld [vmem:[#allocation2 + $0x1f] sm:$0xff] }
 0x1d5   :  { %3129 = vmatprep.mubr.msk.f32.mxu1 %vm439_vm2, %v1597_v18  ;;  %3249 = vmatprep.mubr.msk.f32.mxu0 %vm439_vm2, %v1896_v45  ;;  %v2052_v18 = vld [vmem:[%s4576_s5 + $0x118] sm:$0xff] }
 0x1d6   :  { %3139 = vmatprep.subr.mxu1 %v1156_v32  ;;  %2235 = vperm.xlu1 %3299, %v2197_v36  }
 0x1d7   :  { %3140 = vmatpush3.msra.mxu1 %v1156_v32 }
 0x1d8   :  { %3130 = vmatmul.mubr.msk.f32.gmra.mxu1 %vm439_vm2, %v4158_v50  ;;  %3250 = vmatmul.mubr.msk.f32.gmra.mxu0 %vm439_vm2, %v1897_v21  ;;  %v1452_v50 = vld [vmem:[#allocation2 + $0x3f] sm:$0x3] }
 0x1d9   :  { %3132 = vmatprep.mubr.msk.f32.mxu1 %vm439_vm2, %v1599_v23  ;;  %3252 = vmatprep.mubr.msk.f32.mxu0 %vm439_vm2, %v1898_v56  ;;  %v2051_v23 = vld [vmem:[%s4576_s5 + $0x110] sm:$0xff] }
 0x1da   :  { %3141 = vmatprep.subr.mxu1 %v1155_v41 }
 0x1db   :  { %3142 = vmatpush3.msra.mxu1 %v1155_v41 }
 0x1dc   :  { %3133 = vmatmul.mubr.msk.f32.gmra.mxu1 %vm439_vm2, %v872_v20  ;;  %3253 = vmatmul.mubr.msk.f32.gmra.mxu0 %vm439_vm2, %v1899_v46 }
 0x1dd   :  { %3143 = vmatprep.mubr.msk.f32.mxu1 %vm439_vm2, %v1147_v47  ;;  %3155 = vmatprep.subr.mxu1 %v1307_v44 }
 0x1e0   :  { %3144 = vmatmul.mubr.msk.f32.vlgmr.msra.gmra.mxu1 %vm439_vm2, %v1148_v51 }
 0x1e1   :  { %3156 = vmatpush3.msra.mxu1 %v1307_v44  ;;  %3146 = vmatprep.mubr.msk.f32.mxu1 %vm439_vm2, %v1149_v54 }
 0x1e2   :  { %3157 = vmatprep.subr.mxu1 %v1306_v55 }
 0x1e3   :  { %3158 = vmatpush3.msra.mxu1 %v1306_v55 }
 0x1e4   :  { %3147 = vmatmul.mubr.msk.f32.gmra.mxu1 %vm439_vm2, %v1150_v60  ;;  %3159 = vmatprep.subr.mxu1 %v1305_v62 }
 0x1e5   :  { %3149 = vmatprep.mubr.msk.f32.mxu1 %vm439_vm2, %v1151_v22  ;;  %3160 = vmatpush3.msra.mxu1 %v1305_v62 }
 0x1e6   :  { %3161 = vmatprep.subr.mxu1 %v1304_v4 }
 0x1e7   :  { %3162 = vmatpush3.msra.mxu1 %v1304_v4 }
 0x1e8   :  { %3150 = vmatmul.mubr.msk.f32.gmra.mxu1 %vm439_vm2, %v1152_v2  ;;  %3175 = vmatprep.subr.mxu1 %v1456_v12 }
 0x1e9   :  { %3152 = vmatprep.mubr.msk.f32.mxu1 %vm439_vm2, %v1153_v42 }
 0x1ec   :  { %3153 = vmatmul.mubr.msk.f32.gmra.mxu1 %vm439_vm2, %v1154_v8 }
 0x1ed   :  { %3163 = vmatprep.mubr.msk.f32.mxu1 %vm439_vm2, %v1296_v31 }
 0x1f0   :  { %3164 = vmatmul.mubr.msk.f32.vlgmr.msra.gmra.mxu1 %vm439_vm2, %v4244_v53 }
 0x1f1   :  { %3176 = vmatpush3.msra.mxu1 %v1456_v12  ;;  %3166 = vmatprep.mubr.msk.f32.mxu1 %vm439_vm2, %v4251_v13 }
 0x1f2   :  { %3177 = vmatprep.subr.mxu1 %v1455_v24 }
 0x1f3   :  { %3178 = vmatpush3.msra.mxu1 %v1455_v24 }
 0x1f4   :  { %3167 = vmatmul.mubr.msk.f32.gmra.mxu1 %vm439_vm2, %v4258_v28  ;;  %3179 = vmatprep.subr.mxu1 %v1454_v17 }
 0x1f5   :  { %3169 = vmatprep.mubr.msk.f32.mxu1 %vm439_vm2, %v4265_v16  ;;  %3180 = vmatpush3.msra.mxu1 %v1454_v17 }
 0x1f6   :  { %3181 = vmatprep.subr.mxu1 %v1453_v26 }
 0x1f7   :  { %3182 = vmatpush3.msra.mxu1 %v1453_v26 }
 0x1f8   :  { %3170 = vmatmul.mubr.msk.f32.gmra.mxu1 %vm439_vm2, %v4272_v43  ;;  %3215 = vmatprep.subr.mxu1 %v1754_v37 }
 0x1f9   :  { %3172 = vmatprep.mubr.msk.f32.mxu1 %vm439_vm2, %v4276_v52 }
 0x1fc   :  { %3173 = vmatmul.mubr.msk.f32.gmra.mxu1 %vm439_vm2, %v1303_v49 }
 0x1fd   :  { %3183 = vmatprep.mubr.msk.f32.mxu1 %vm439_vm2, %v1445_v61 }
 0x200   :  { %3184 = vmatmul.mubr.msk.f32.vlgmr.msra.gmra.mxu1 %vm439_vm2, %v1446_v58 }
 0x201   :  { %3216 = vmatpush3.msra.mxu1 %v1754_v37  ;;  %3186 = vmatprep.mubr.msk.f32.mxu1 %vm439_vm2, %v1447_v3 }
 0x202   :  { %3217 = vmatprep.subr.mxu1 %v1753_v6 }
 0x203   :  { %3218 = vmatpush3.msra.mxu1 %v1753_v6 }
 0x204   :  { %3187 = vmatmul.mubr.msk.f32.gmra.mxu1 %vm439_vm2, %v1448_v63  ;;  %3219 = vmatprep.subr.mxu1 %v1752_v15 }
 0x205   :  { %3189 = vmatprep.mubr.msk.f32.mxu1 %vm439_vm2, %v1449_v11  ;;  %3220 = vmatpush3.msra.mxu1 %v1752_v15 }
 0x206   :  { %3221 = vmatprep.subr.mxu1 %v1751_v0 }
 0x207   :  { %3222 = vmatpush3.msra.mxu1 %v1751_v0 }
 0x208   :  { %3190 = vmatmul.mubr.msk.f32.gmra.mxu1 %vm439_vm2, %v1450_v57  ;;  %3255 = vmatprep.subr.mxu1 %v2052_v18 }
 0x209   :  { %3192 = vmatprep.mubr.msk.f32.mxu1 %vm439_vm2, %v1451_v10 }
 0x20c   :  { %3193 = vmatmul.mubr.msk.f32.gmra.mxu1 %vm439_vm2, %v1452_v50 }
 0x20d   :  { %3223 = vmatprep.mubr.msk.f32.mxu1 %vm439_vm2, %v1743_v34 }
 0x210   :  { %3224 = vmatmul.mubr.msk.f32.vlgmr.msra.gmra.mxu1 %vm439_vm2, %v1744_v19 }
 0x211   :  { %3256 = vmatpush3.msra.mxu1 %v2052_v18  ;;  %3226 = vmatprep.mubr.msk.f32.mxu1 %vm439_vm2, %v1745_v25 }
 0x212   :  { %3257 = vmatprep.subr.mxu1 %v2051_v23 }
 0x213   :  { %3258 = vmatpush3.msra.mxu1 %v2051_v23 }
 0x214   :  { %3227 = vmatmul.mubr.msk.f32.gmra.mxu1 %vm439_vm2, %v1746_v48  ;;  %3259 = vmatprep.subr.mxu1 %v2050_v27 }
 0x215   :  { %3229 = vmatprep.mubr.msk.f32.mxu1 %vm439_vm2, %v1747_v38  ;;  %3260 = vmatpush3.msra.mxu1 %v2050_v27 }
 0x216   :  { %3261 = vmatprep.subr.mxu1 %v2049_v14 }
 0x217   :  { %3262 = vmatpush3.msra.mxu1 %v2049_v14 }
 0x218   :  { %3230 = vmatmul.mubr.msk.f32.gmra.mxu1 %vm439_vm2, %v1748_v39 }
 0x219   :  { %3232 = vmatprep.mubr.msk.f32.mxu1 %vm439_vm2, %v1749_v29 }
 0x21c   :  { %3233 = vmatmul.mubr.msk.f32.gmra.mxu1 %vm439_vm2, %v1750_v33 }
 0x21d   :  { %3263 = vmatprep.mubr.msk.f32.mxu1 %vm439_vm2, %v4244_v53 }
 0x220   :  { %3264 = vmatmul.mubr.msk.f32.vlgmr.msra.gmra.mxu1 %vm439_vm2, %v4251_v13 }
 0x221   :  { %3266 = vmatprep.mubr.msk.f32.mxu1 %vm439_vm2, %v4258_v28 }
 0x224   :  { %3267 = vmatmul.mubr.msk.f32.gmra.mxu1 %vm439_vm2, %v4265_v16 }
 0x225   :  { %3269 = vmatprep.mubr.msk.f32.mxu1 %vm439_vm2, %v4272_v43 }
 0x228   :  { %3270 = vmatmul.mubr.msk.f32.gmra.mxu1 %vm439_vm2, %v4276_v52 }
 0x229   :  { %3272 = vmatprep.mubr.msk.f32.mxu1 %vm439_vm2, %v2047_v1 }
 0x22c   :  { %3273 = vmatmul.mubr.msk.f32.gmra.mxu1 %vm439_vm2, %v2048_v5 }
 0x27f   :  { %v3105_v7 = vpop.f32.mrf.mxu1 }
 0x280   :  { %v3205_v28 = vpop.f32.mrf.mxu0 }
 0x281   :  { %v979_v9 = vpop.f32.mrf.mxu1 }
 0x282   :  { %v1696_v37 = vpop.f32.mrf.mxu0 }
 0x284   :  { %v3108_v59 = vpop.f32.mrf.mxu1  ;;  %v3208_v49 = vpop.f32.mrf.mxu0 }
 0x286   :  { %v989_v30 = vpop.f32.mrf.mxu1  ;;  %v4340_v6 = vpop.f32.mrf.mxu0 }
 0x288   :  { %v3111_v35 = vpop.f32.mrf.mxu1  ;;  %v4344_v63 = vpop.f32.mrf.mxu0 }
 0x28a   :  { %v999_v32 = vpop.f32.mrf.mxu1  ;;  %v4346_v18 = vpop.f32.mrf.mxu0 }
 0x28c   :  { %v3114_v40 = vpop.f32.mrf.mxu1  ;;  %v4348_v50 = vpop.f32.mrf.mxu0 }
 0x28e   :  { %v1009_v45 = vpop.f32.mrf.mxu1  ;;  %v4350_v23 = vpop.f32.mrf.mxu0 }
 0x290   :  { %v3125_v36 = vpop.f32.mrf.mxu1  ;;  %v3245_v48 = vpop.f32.mrf.mxu0 }
 0x291   :  { %v1114_v21 = vadd.f32 %v3125_v36, %v3105_v7 }
 0x292   :  { %v1108_v41 = vpop.f32.mrf.mxu1  ;;  %v4354_v29 = vpop.f32.mrf.mxu0 }
 0x293   :  { %v1109_v56 = vadd.f32 %v1108_v41, %v979_v9 }
 0x294   :  { %v3128_v44 = vpop.f32.mrf.mxu1 }
 0x295   :  { %v1124_v20 = vadd.f32 %v3128_v44, %v3108_v59 }
 0x296   :  { %v1118_v46 = vpop.f32.mrf.mxu1 }
 0x297   :  { %v1119_v47 = vadd.f32 %v1118_v46, %v989_v30 }
 0x298   :  { %v3131_v51 = vpop.f32.mrf.mxu1 }
 0x299   :  { %v1134_v55 = vadd.f32 %v3131_v51, %v3111_v35  ;;  %v4356_v35 = vpop.f32.mrf.mxu0  ;;  %v2529_v51 = vld [vmem:[%s4579_s8 + $0xf0] sm:$0xff] }
 0x29a   :  { %v1128_v54 = vpop.f32.mrf.mxu1 }
 0x29b   :  { %v4332_v62 = vadd.f32 %v1128_v54, %v999_v32 }
 0x29c   :  { %v3134_v60 = vpop.f32.mrf.mxu1 }
 0x29d   :  { %v4334_v4 = vadd.f32 %v3134_v60, %v3114_v40  ;;  %v4372_v60 = vpop.f32.mrf.mxu0 }
 0x29e   :  { %v1138_v22 = vpop.f32.mrf.mxu1 }
 0x29f   :  { %v4336_v12 = vadd.f32 %v1138_v22, %v1009_v45 }
 0x2a0   :  { %v3145_v2 = vpop.f32.mrf.mxu1 }
 0x2a1   :  { %v1289_v38 = vadd.f32 %v3145_v2, %v1114_v21 }
 0x2a2   :  { %v1249_v42 = vpop.f32.mrf.mxu1 }
 0x2a3   :  { %v1288_v33 = vadd.f32 %v1249_v42, %v1109_v56  ;;  %v2530_v56 = vld [vmem:[%s4579_s8 + $0xf8] sm:$0xff] }
 0x2a4   :  { %v3148_v8 = vpop.f32.mrf.mxu1  ;;  %2992 = vmatprep.subr.mxu0 %v2530_v56 }
 0x2a5   :  { %v1291_v7 = vadd.f32 %v3148_v8, %v1124_v20  ;;  %v2514_v20 = vld [vmem:[%s4579_s8 + $0x78] sm:$0xff] }
 0x2a6   :  { %v1259_v31 = vpop.f32.mrf.mxu1  ;;  %2993 = vmatpush3.msra.mxu0 %v2514_v20  ;;  %v2507_v20 = vld [vmem:[%s4579_s8 + $0x40] sm:$0xff] }
 0x2a7   :  { %v1290_v32 = vadd.f32 %v1259_v31, %v1119_v47  ;;  %v2528_v31 = vld [vmem:[%s4579_s8 + $0xe8] sm:$0xff]  ;;  %2994 = vmatprep.subr.mxu0 %v2529_v51 }
 0x2a8   :  { %v3151_v53 = vpop.f32.mrf.mxu1 }
 0x2a9   :  { %v1293_v36 = vadd.f32 %v3151_v53, %v1134_v55  ;;  %v2513_v55 = vld [vmem:[%s4579_s8 + $0x70] sm:$0xff] }
 0x2aa   :  { %v1269_v24 = vpop.f32.mrf.mxu1  ;;  %2995 = vmatpush3.msra.mxu0 %v2513_v55 }
 0x2ab   :  { %v1292_v22 = vadd.f32 %v1269_v24, %v4332_v62  ;;  %v2512_v62 = vld [vmem:[%s4579_s8 + $0x68] sm:$0xff]  ;;  %2996 = vmatprep.subr.mxu0 %v2528_v31 }
 0x2ac   :  { %v3154_v13 = vpop.f32.mrf.mxu1  ;;  %2997 = vmatpush3.msra.mxu0 %v2512_v62 }
 0x2ad   :  { %v1295_v53 = vadd.f32 %v3154_v13, %v4334_v4 }
 0x2ae   :  { %v4338_v17 = vpop.f32.mrf.mxu1 }
 0x2af   :  { %v1294_v4 = vadd.f32 %v4338_v17, %v4336_v12  ;;  %v2526_v12 = vld [vmem:[%s4579_s8 + $0xd8] sm:$0xff] }
 0x2b0   :  { %v3165_v26 = vpop.f32.mrf.mxu1 }
 0x2b1   :  { %v1438_v1 = vadd.f32 %v3165_v26, %v1289_v38  ;;  %v4379_v26 = vpop.permute.xlu0 %2200 }
 0x2b2   :  { %v1398_v16 = vpop.f32.mrf.mxu1 }
 0x2b3   :  { %v1437_v9 = vadd.f32 %v1398_v16, %v1288_v33 }
 0x2b4   :  { %v3168_v43 = vpop.f32.mrf.mxu1 }
 0x2b5   :  { %v1440_v40 = vadd.f32 %v3168_v43, %v1291_v7 }
 0x2b6   :  { %v1408_v52 = vpop.f32.mrf.mxu1 }
 0x2b7   :  { %v1439_v44 = vadd.f32 %v1408_v52, %v1290_v32  ;;  %v2527_v52 = vld [vmem:[%s4579_s8 + $0xe0] sm:$0xff] }
 0x2b8   :  { %v3171_v61 = vpop.f32.mrf.mxu1  ;;  %2998 = vmatprep.subr.mxu0 %v2527_v52 }
 0x2b9   :  { %v1442_v47 = vadd.f32 %v3171_v61, %v1293_v36  ;;  %v4391_v61 = vpop.permute.xlu1 %2210 }
 0x2ba   :  { %v1418_v58 = vpop.f32.mrf.mxu1 }
 0x2bb   :  { %v1441_v24 = vadd.f32 %v1418_v58, %v1292_v22  ;;  %v3251_v58 = vpop.f32.mrf.mxu0 }
 0x2bc   :  { %v3174_v3 = vpop.f32.mrf.mxu1 }
 0x2bd   :  { %v1444_v13 = vadd.f32 %v3174_v3, %v1295_v53  ;;  %v2014_v7 = vpop.f32.mrf.mxu0 }
 0x2be   :  { %v4342_v15 = vpop.f32.mrf.mxu1 }
 0x2bf   :  { %v1443_v17 = vadd.f32 %v4342_v15, %v1294_v4  ;;  %v3254_v51 = vpop.f32.mrf.mxu0 }
 0x2c0   :  { %v3185_v0 = vpop.f32.mrf.mxu1 }
 0x2c1   :  { %v1587_v59 = vadd.f32 %v3185_v0, %v1438_v1 }
 0x2c2   :  { %v1547_v11 = vpop.f32.mrf.mxu1 }
 0x2c3   :  { %v1586_v45 = vadd.f32 %v1547_v11, %v1437_v9  ;;  %v1736_v21 = vadd.f32 %v3205_v28, %v1587_v59  ;;  %v2511_v11 = vld [vmem:[%s4579_s8 + $0x60] sm:$0xff] }
 0x2c4   :  { %v3188_v57 = vpop.f32.mrf.mxu1  ;;  %2999 = vmatpush3.msra.mxu0 %v2511_v11 }
 0x2c5   :  { %v1589_v46 = vadd.f32 %v3188_v57, %v1440_v40  ;;  %v1735_v8 = vadd.f32 %v1696_v37, %v1586_v45  ;;  %3000 = vmatprep.subr.mxu0 %v2526_v12  ;;  %v4427_v40 = vpop.permute.xlu1 %2215 }
 0x2c6   :  { %v1557_v10 = vpop.f32.mrf.mxu1 }
 0x2c7   :  { %v1588_v2 = vadd.f32 %v1557_v10, %v1439_v44  ;;  %v1738_v37 = vadd.f32 %v3208_v49, %v1589_v46 }
 0x2c8   :  { %v3191_v34 = vpop.f32.mrf.mxu1 }
 0x2c9   :  { %v1591_v28 = vadd.f32 %v3191_v34, %v1442_v47  ;;  %v1737_v10 = vadd.f32 %v4340_v6, %v1588_v2  ;;  %v2226_v62 = vpop.permute.xlu1 %2225 }
 0x2ca   :  { %v1567_v19 = vpop.f32.mrf.mxu1 }
 0x2cb   :  { %v1590_v57 = vadd.f32 %v1567_v19, %v1441_v24  ;;  %v2510_v19 = vld [vmem:[%s4579_s8 + $0x58] sm:$0xff] }
 0x2cc   :  { %v3194_v25 = vpop.f32.mrf.mxu1  ;;  %3001 = vmatpush3.msra.mxu0 %v2510_v19 }
 0x2cd   :  { %v1593_v3 = vadd.f32 %v3194_v25, %v1444_v13  ;;  %v1739_v9 = vadd.f32 %v4346_v18, %v1590_v57  ;;  %v2508_v18 = vld [vmem:[%s4579_s8 + $0x48] sm:$0xff] }
 0x2ce   :  { %v4352_v27 = vpop.f32.mrf.mxu1 }
 0x2cf   :  { %v1592_v15 = vadd.f32 %v4352_v27, %v1443_v17  ;;  %v2524_v27 = vld [vmem:[%s4579_s8 + $0xc8] sm:$0xff]  ;;  %v1742_v32 = vadd.f32 %v4348_v50, %v1593_v3  ;;  %v2523_v50 = vld [vmem:[%s4579_s8 + $0xc0] sm:$0xff] }
 0x2d0   :  { %v3225_v14 = vpop.f32.mrf.mxu1 }
 0x2d1   :  { %v1885_v42 = vadd.f32 %v3225_v14, %v1736_v21  ;;  %v1740_v14 = vadd.f32 %v4344_v63, %v1591_v28  ;;  %v4412_v63 = vpop.permute.xlu0 %2205  ;;  %v1741_v46 = vadd.f32 %v4350_v23, %v1592_v15  ;;  %v2522_v23 = vld [vmem:[%s4579_s8 + $0xb8] sm:$0xff] }
 0x2d2   :  { %v1845_v39 = vpop.f32.mrf.mxu1 }
 0x2d3   :  { %v1884_v43 = vadd.f32 %v1845_v39, %v1735_v8  ;;  %v2034_v34 = vadd.f32 %v3245_v48, %v1885_v42  ;;  %v2525_v48 = vld [vmem:[%s4579_s8 + $0xd0] sm:$0xff] }
 0x2d4   :  { %v3228_v5 = vpop.f32.mrf.mxu1  ;;  %3002 = vmatprep.subr.mxu0 %v2525_v48 }
 0x2d5   :  { %v1887_v49 = vadd.f32 %v3228_v5, %v1738_v37  ;;  %v2033_v6 = vadd.f32 %v4354_v29, %v1884_v43  ;;  %v2509_v5 = vld [vmem:[%s4579_s8 + $0x50] sm:$0xff]  ;;  %v2221_v8 = vpop.permute.xlu0 %2220  ;;  %v2024_v43 = vpop.f32.mrf.mxu0 }
 0x2d6   :  { %v1855_v30 = vpop.f32.mrf.mxu1  ;;  %3003 = vmatpush3.msra.mxu0 %v2509_v5 }
 0x2d7   :  { %v1886_v39 = vadd.f32 %v1855_v30, %v1737_v10  ;;  %v2036_v30 = vadd.f32 %v4356_v35, %v1887_v49  ;;  %3004 = vmatprep.subr.mxu0 %v2524_v27 }
 0x2d8   :  { %v3231_v41 = vpop.f32.mrf.mxu1  ;;  %3005 = vmatpush3.msra.mxu0 %v2508_v18 }
 0x2d9   :  { %v1889_v25 = vadd.f32 %v3231_v41, %v1740_v14  ;;  %v2035_v44 = vadd.f32 %v4372_v60, %v1886_v39  ;;  %3006 = vmatprep.subr.mxu0 %v2523_v50  ;;  %v2231_v14 = vpop.permute.xlu0 %2230 }
 0x2da   :  { %v4367_v54 = vpop.f32.mrf.mxu1  ;;  %3007 = vmatpush3.msra.mxu0 %v2507_v20 }
 0x2db   :  { %v1888_v36 = vadd.f32 %v4367_v54, %v1739_v9  ;;  %v2038_v56 = vadd.f32 %v3251_v58, %v1889_v25  ;;  %3008 = vmatprep.subr.mxu0 %v2522_v23 }
 0x2dc   :  { %v4381_v16 = vpop.f32.mrf.mxu1 }
 0x2dd   :  { %v1891_v47 = vadd.f32 %v4381_v16, %v1742_v32  ;;  %v2037_v16 = vadd.f32 %v2014_v7, %v1888_v36 }
 0x2de   :  { %v1875_v0 = vpop.f32.mrf.mxu1 }
 0x2df   :  { %v1890_v22 = vadd.f32 %v1875_v0, %v1741_v46  ;;  %v2040_v4 = vadd.f32 %v3254_v51, %v1891_v47 }
 0x2e0   :  { %v3265_v38 = vpop.f32.mrf.mxu1 }
 0x2e1   :  { %v4405_v33 = vadd.f32 %v3265_v38, %v2034_v34  ;;  %v2039_v11 = vadd.f32 %v2024_v43, %v1890_v22  ;;  %v2236_v38 = vpop.permute.xlu1 %2235 }
 0x2e2   :  { %v2143_v1 = vpop.f32.mrf.mxu1 }
 0x2e3   :  { %v2239_v29 = vmul.f32 %v4412_v63, %v4405_v33  ;;  %v4420_v59 = vadd.f32 %v2143_v1, %v2033_v6 }
 0x2e4   :  { %v3268_v45 = vpop.f32.mrf.mxu1 }
 0x2e5   :  { %v2238_v35 = vmul.f32 %v4379_v26, %v4420_v59  ;;  %v4435_v41 = vadd.f32 %v3268_v45, %v2036_v30  ;;  %v2248_v54 = vsel %vm2246_vm3, %v2239_v29, 0.0 }
 0x2e6   :  { %v2153_v21 = vpop.f32.mrf.mxu1 }
 0x2e7   :  { %v2247_v55 = vsel %vm2246_vm3, %v2238_v35, 0.0  ;;  %v2184_v60 = vadd.f32 %v2153_v21, %v2035_v44  ;;  %v2241_v31 = vmul.f32 %v4427_v40, %v4435_v41 }
 0x2e8   :  { %v2249_v2 = vadd.f32 %v2248_v54, %v2247_v55  ;;  %v3271_v42 = vpop.f32.mrf.mxu1 }
 0x2e9   :  { %v2240_v53 = vmul.f32 %v4391_v61, %v2184_v60  ;;  %v2187_v28 = vadd.f32 %v3271_v42, %v2038_v56  ;;  %v2252_v58 = vsel %vm2246_vm3, %v2241_v31, 0.0 }
 0x2ea   :  { %v2163_v24 = vpop.f32.mrf.mxu1 }
 0x2eb   :  { %v2250_v37 = vsel %vm2246_vm3, %v2240_v53, 0.0  ;;  %v2186_v52 = vadd.f32 %v2163_v24, %v2037_v16  ;;  %v2243_v57 = vmul.f32 %v2226_v62, %v2187_v28 }
 0x2ec   :  { %v2251_v13 = vadd.f32 %v2250_v37, %v2249_v2  ;;  %v3274_v0 = vpop.f32.mrf.mxu1 }
 0x2ed   :  { %v2242_v49 = vmul.f32 %v2221_v8, %v2186_v52  ;;  %v2189_v10 = vadd.f32 %v3274_v0, %v2040_v4  ;;  %v2256_v39 = vsel %vm2246_vm3, %v2243_v57, 0.0 }
 0x2ee   :  { %v2253_v34 = vadd.f32 %v2252_v58, %v2251_v13  ;;  %v2173_v12 = vpop.f32.mrf.mxu1 }
 0x2ef   :  { %v2254_v17 = vsel %vm2246_vm3, %v2242_v49, 0.0  ;;  %v2188_v3 = vadd.f32 %v2173_v12, %v2039_v11  ;;  %v2245_v6 = vmul.f32 %v2236_v38, %v2189_v10 }
 0x2f0   :  { %v2255_v19 = vadd.f32 %v2254_v17, %v2253_v34 }
 0x2f1   :  { %v2244_v48 = vmul.f32 %v2231_v14, %v2188_v3  ;;  %v2261_v5 = vsel %vm2260_vm4, %v2245_v6, 0.0 }
 0x2f2   :  { %v2257_v15 = vadd.f32 %v2256_v39, %v2255_v19  ;;  %v2838_v19 = vld [vmem:[%s4577_s6] ss:$0 sm:$0xff] }
 0x2f3   :  { %v2258_v25 = vsel %vm2246_vm3, %v2244_v48, 0.0 }
 0x2f4   :  { %v2259_v1 = vadd.f32 %v2258_v25, %v2257_v15  ;;  %v2839_v25 = vld [vmem:[%s4578_s7] ss:$0 sm:$0xff] }
 0x2f6   :  { %v2262_v7 = vadd.f32 %v2261_v5, %v2259_v1  ;;  %v2390_v5 = vlaneseq }
 0x2f8   :  { %v2263_v9 = vrot.slane %v2262_v7, 4 }
 0x2fa   :  { %v2264_v29 = vadd.f32 %v2263_v9, %v2262_v7 }
 0x2fc   :  { %v2265_v30 = vrot.slane %v2264_v29, 2 }
 0x2fe   :  { %v2266_v27 = vadd.f32 %v2265_v30, %v2264_v29 }
 0x300   :  { %v2267_v32 = vrot.slane %v2266_v27, 1 }
 0x302   :  { %v2268_v45 = vadd.f32 %v2267_v32, %v2266_v27 }
 0x304   :  { %v2270_v18 = vmul.f32 0.03125, %v2268_v45 }
 0x306   :  { %v2271_v36 = vsub.f32 %v4420_v59, %v2270_v18  ;;  %v2272_v35 = vsub.f32 %v4405_v33, %v2270_v18  ;;  %v2273_v44 = vsub.f32 %v2184_v60, %v2270_v18  ;;  %v2274_v50 = vsub.f32 %v4435_v41, %v2270_v18 }
 0x307   :  { %v2275_v46 = vsub.f32 %v2186_v52, %v2270_v18  ;;  %v2276_v21 = vsub.f32 %v2187_v28, %v2270_v18  ;;  %v2277_v56 = vsub.f32 %v2188_v3, %v2270_v18  ;;  %v2278_v20 = vsub.f32 %v2189_v10, %v2270_v18 }
 0x308   :  { %v2279_v51 = vmul.f32 %v2271_v36, %v4379_v26  ;;  %v2280_v47 = vmul.f32 %v2272_v35, %v4412_v63  ;;  %v2281_v54 = vmul.f32 %v2273_v44, %v4391_v61  ;;  %v2282_v55 = vmul.f32 %v2274_v50, %v4427_v40 }
 0x309   :  { %v2283_v23 = vmul.f32 %v2275_v46, %v2221_v8  ;;  %v2284_v33 = vmul.f32 %v2276_v21, %v2226_v62  ;;  %v2285_v53 = vmul.f32 %v2277_v56, %v2231_v14  ;;  %v2286_v16 = vmul.f32 %v2278_v20, %v2236_v38 }
 0x30a   :  { %v2287_v22 = vmul.f32 %v2279_v51, %v2279_v51  ;;  %v2288_v59 = vmul.f32 %v2280_v47, %v2280_v47  ;;  %v2289_v2 = vmul.f32 %v2281_v54, %v2281_v54  ;;  %v2290_v60 = vmul.f32 %v2282_v55, %v2282_v55 }
 0x30b   :  { %v2291_v28 = vmul.f32 %v2283_v23, %v2283_v23  ;;  %v2292_v61 = vmul.f32 %v2284_v33, %v2284_v33  ;;  %v2293_v24 = vmul.f32 %v2285_v53, %v2285_v53  ;;  %v2294_v37 = vmul.f32 %v2286_v16, %v2286_v16 }
 0x30c   :  { %v2295_v41 = vsel %vm2246_vm3, %v2287_v22, 0.0  ;;  %v2296_v42 = vsel %vm2246_vm3, %v2288_v59, 0.0  ;;  %v2298_v26 = vsel %vm2246_vm3, %v2289_v2, 0.0  ;;  %v2300_v40 = vsel %vm2246_vm3, %v2290_v60, 0.0 }
 0x30d   :  { %v2297_v31 = vadd.f32 %v2296_v42, %v2295_v41  ;;  %v2302_v43 = vsel %vm2246_vm3, %v2291_v28, 0.0  ;;  %v2304_v52 = vsel %vm2246_vm3, %v2292_v61, 0.0  ;;  %v2306_v13 = vsel %vm2246_vm3, %v2293_v24, 0.0 }
 0x30e   :  { %v2308_v11 = vsel %vm2260_vm4, %v2294_v37, 0.0  ;;  %v3327_v18 = vmov 1983009808   ;;  %v2391_v55 = vshrl.u32 %v2390_v5, 7 }
 0x30f   :  { %v2299_v63 = vadd.f32 %v2298_v26, %v2297_v31  ;;  %v2388_v50 = vunpack.c.l.s4 %v3327_v18 }
 0x311   :  { %v2301_v8 = vadd.f32 %v2300_v40, %v2299_v63  ;;  %v2389_v33 = vunpack.c.0.s8 %v2388_v50 }
 0x313   :  { %v2303_v62 = vadd.f32 %v2302_v43, %v2301_v8  ;;  %v4481_v24 = vsub.s32 %v2389_v33, %v2391_v55  ;;  %v2502_v33 = vld [vmem:[%s4579_s8 + $0x18] sm:$0xff] }
 0x315   :  { %v2305_v4 = vadd.f32 %v2304_v52, %v2303_v62 }
 0x317   :  { %v2307_v0 = vadd.f32 %v2306_v13, %v2305_v4 }
 0x319   :  { %v2309_v58 = vadd.f32 %v2308_v11, %v2307_v0 }
 0x31b   :  { %v2310_v57 = vrot.slane %v2309_v58, 4 }
 0x31d   :  { %v2311_v49 = vadd.f32 %v2310_v57, %v2309_v58 }
 0x31f   :  { %v2312_v10 = vrot.slane %v2311_v49, 2 }
 0x321   :  { %v2313_v34 = vadd.f32 %v2312_v10, %v2311_v49 }
 0x323   :  { %v2314_v12 = vrot.slane %v2313_v34, 1 }
 0x325   :  { %v2315_v17 = vadd.f32 %v2314_v12, %v2313_v34 }
 0x327   :  { %v2316_v3 = vmul.f32 0.03125, %v2315_v17 }
 0x329   :  { %v2317_v14 = vadd.f32 1e-05, %v2316_v3 }
 0x32b   :  { %3302 = vrsqrt.f32 %v2317_v14 }
 0x338   :  { %v3303_v38 = vpop.eup %3302 }
 0x339   :  { %v2323_v39 = vmul.f32 %v3303_v38, %v2276_v21  ;;  %v2324_v6 = vmul.f32 %v3303_v38, %v2277_v56  ;;  %v2325_v48 = vmul.f32 %v3303_v38, %v2278_v20  ;;  %v2320_v15 = vmul.f32 %v3303_v38, %v2272_v35 }
 0x33a   :  { %v2321_v1 = vmul.f32 %v3303_v38, %v2273_v44  ;;  %v2319_v7 = vmul.f32 %v3303_v38, %v2271_v36  ;;  %v2322_v9 = vmul.f32 %v3303_v38, %v2275_v46 }
 0x33b   :  { %v2338_v29 = vmul.f32 %v2838_v19, %v2324_v6  ;;  %v2334_v30 = vmul.f32 %v2838_v19, %v2320_v15  ;;  %v2339_v27 = vmul.f32 %v2838_v19, %v2325_v48  ;;  %v2337_v32 = vmul.f32 %v2838_v19, %v2323_v39  ;;  %v2521_v39 = vld [vmem:[%s4579_s8 + $0xb0] sm:$0xff] }
 0x33c   :  { %v2335_v45 = vmul.f32 %v2838_v19, %v2321_v1  ;;  %v2333_v51 = vmul.f32 %v2838_v19, %v2319_v7  ;;  %v2336_v21 = vmul.f32 %v2838_v19, %v2322_v9  ;;  %v2506_v19 = vld [vmem:[%s4579_s8 + $0x38] sm:$0xff]  ;;  %v2505_v6 = vld [vmem:[%s4579_s8 + $0x30] sm:$0xff] }
 0x33d   :  { %v2352_v56 = vadd.f32 %v2839_v25, %v2338_v29  ;;  %v2348_v20 = vadd.f32 %v2839_v25, %v2334_v30  ;;  %v2353_v35 = vadd.f32 %v2839_v25, %v2339_v27  ;;  %v2351_v47 = vadd.f32 %v2839_v25, %v2337_v32  ;;  %3009 = vmatpush3.msra.mxu0 %v2506_v19 }
 0x33e   :  { %v2349_v54 = vadd.f32 %v2839_v25, %v2335_v45  ;;  %v2347_v23 = vadd.f32 %v2839_v25, %v2333_v51  ;;  %v2350_v44 = vadd.f32 %v2839_v25, %v2336_v21  ;;  %v2520_v25 = vld [vmem:[%s4579_s8 + $0xa8] sm:$0xff]  ;;  %3010 = vmatprep.subr.mxu0 %v2521_v39 }
 0x33f   :  { %v2359_v22 = vmax.f32 %v2352_v56, 0.0  ;;  %v2355_v36 = vmax.f32 %v2348_v20, 0.0  ;;  %v2360_v46 = vmax.f32 %v2353_v35, 0.0  ;;  %v2358_v59 = vmax.f32 %v2351_v47, 0.0  ;;  %3011 = vmatpush3.msra.mxu0 %v2505_v6  ;;  %v2504_v20 = vld [vmem:[%s4579_s8 + $0x28] sm:$0xff]  ;;  %v2519_v35 = vld [vmem:[%s4579_s8 + $0xa0] sm:$0xff] }
 0x340   :  { %v2356_v2 = vmax.f32 %v2349_v54, 0.0  ;;  %v2354_v60 = vmax.f32 %v2347_v23, 0.0  ;;  %v2357_v41 = vmax.f32 %v2350_v44, 0.0  ;;  %3012 = vmatprep.subr.mxu0 %v2520_v25  ;;  %v2503_v47 = vld [vmem:[%s4579_s8 + $0x20] sm:$0xff]  ;;  %v2623_v25 = vld [vmem:[%s4581_s10 + $0x18] sm:$0xff] }
 0x341   :  { %v2464_v42 = vrot.slane %v2359_v22, 6  ;;  %v2375_v31 = vrot.slane %v2355_v36, 6  ;;  %v2476_v53 = vrot.slane %v2360_v46, 6  ;;  %v2433_v28 = vrot.slane %v2358_v59, 6  ;;  %3013 = vmatpush3.msra.mxu0 %v2504_v20 }
 0x342   :  { %v2400_v26 = vrot.slane %v2356_v2, 6  ;;  %v2362_v63 = vrot.slane %v2354_v60, 6  ;;  %3014 = vmatprep.subr.mxu0 %v2519_v35 }
 0x343   :  { %v2377_v16 = vmax.f32 %v2354_v60, %v2375_v31  ;;  %v2478_v61 = vmax.f32 %v2359_v22, %v2476_v53  ;;  %v2435_v40 = vmax.f32 %v2357_v41, %v2433_v28  ;;  %v2466_v8 = vmax.f32 %v2359_v22, %v2464_v42  ;;  %v2518_v22 = vld [vmem:[%s4579_s8 + $0x98] sm:$0xff]  ;;  %3015 = vmatpush3.msra.mxu0 %v2503_v47  ;;  %v2517_v53 = vld [vmem:[%s4579_s8 + $0x90] sm:$0xff] }
 0x344   :  { %v2402_v43 = vmax.f32 %v2355_v36, %v2400_v26  ;;  %v2364_v62 = vmax.f32 %v2354_v60, %v2362_v63  ;;  %3016 = vmatprep.subr.mxu0 %v2518_v22  ;;  %v2501_v63 = vld [vmem:[%s4579_s8 + $0x10] sm:$0xff] }
 0x345   :  { %v2379_v37 = vsel %vm2378_vm6, %v2377_v16, -inf  ;;  %v2479_v52 = vsel %vm2378_vm6, %v2478_v61, -inf  ;;  %v2444_v4 = vsel %vm2412_vm5, %v2435_v40, -inf  ;;  %v2467_v13 = vsel %vm2260_vm4, %v2466_v8, -inf  ;;  %3017 = vmatpush3.msra.mxu0 %v2502_v33 }
 0x346   :  { %v2413_v0 = vsel %vm2412_vm5, %v2402_v43, -inf  ;;  %v2380_v11 = vrot.slane %v2379_v37, 4  ;;  %v2480_v58 = vrot.slane %v2479_v52, 4  ;;  %v2445_v57 = vrot.slane %v2444_v4, 4  ;;  %3018 = vmatprep.subr.mxu0 %v2517_v53 }
 0x347   :  { %v2414_v49 = vrot.slane %v2413_v0, 4  ;;  %v2404_v10 = vsel %vm2403_vm7, %v2402_v43, -inf  ;;  %v2365_v34 = vsel %vm2260_vm4, %v2364_v62, -inf  ;;  %v2468_v12 = vrot.slane %v2467_v13, 4  ;;  %v2516_v43 = vld [vmem:[%s4579_s8 + $0x88] sm:$0xff]  ;;  %3019 = vmatpush3.msra.mxu0 %v2501_v63 }
 0x348   :  { %v2381_v17 = vmax.f32 %v2379_v37, %v2380_v11  ;;  %v2481_v3 = vmax.f32 %v2479_v52, %v2480_v58  ;;  %v2446_v14 = vmax.f32 %v2444_v4, %v2445_v57  ;;  %v2405_v38 = vrot.slane %v2404_v10, 4  ;;  %v2500_v4 = vld [vmem:[%s4579_s8 + $0x8] sm:$0xff]  ;;  %v2515_v57 = vld [vmem:[%s4579_s8 + $0x80] sm:$0xff]  ;;  %3020 = vmatprep.subr.mxu0 %v2516_v43 }
 0x349   :  { %v2415_v48 = vmax.f32 %v2413_v0, %v2414_v49  ;;  %v2366_v15 = vrot.slane %v2365_v34, 4  ;;  %v2469_v1 = vmax.f32 %v2467_v13, %v2468_v12  ;;  %v2436_v5 = vsel %vm2403_vm7, %v2435_v40, -inf  ;;  %v2499_v49 = vld [vmem:[%s4579_s8] sm:$0xff]  ;;  %3021 = vmatpush3.msra.mxu0 %v2500_v4 }
 0x34a   :  { %v2382_v7 = vrot.slane %v2381_v17, 2  ;;  %v2482_v9 = vrot.slane %v2481_v3, 2  ;;  %v2447_v29 = vrot.slane %v2446_v14, 2  ;;  %v2406_v30 = vmax.f32 %v2404_v10, %v2405_v38  ;;  %3022 = vmatprep.subr.mxu0 %v2515_v57 }
 0x34b   :  { %v2416_v27 = vrot.slane %v2415_v48, 2  ;;  %v2367_v32 = vmax.f32 %v2365_v34, %v2366_v15  ;;  %v2470_v45 = vrot.slane %v2469_v1, 2  ;;  %v2437_v18 = vrot.slane %v2436_v5, 4  ;;  %3023 = vmatpush3.msra.mxu0 %v2499_v49 }
 0x34c   :  { %v2383_v50 = vmax.f32 %v2381_v17, %v2382_v7  ;;  %v2483_v51 = vmax.f32 %v2481_v3, %v2482_v9  ;;  %v2448_v21 = vmax.f32 %v2446_v14, %v2447_v29  ;;  %v2407_v56 = vrot.slane %v2406_v30, 2  ;;  %v2626_v17 = vld [vmem:[%s4581_s10 + $0x30] sm:$0x3]  ;;  %v2625_v14 = vld [vmem:[%s4581_s10 + $0x28] sm:$0xff]  ;;  %v2620_v7 = vld [vmem:[%s4581_s10] sm:$0xff] }
 0x34d   :  { %v2417_v54 = vmax.f32 %v2415_v48, %v2416_v27  ;;  %v2368_v55 = vrot.slane %v2367_v32, 2  ;;  %v2471_v23 = vmax.f32 %v2469_v1, %v2470_v45  ;;  %v2438_v44 = vmax.f32 %v2436_v5, %v2437_v18  ;;  %v2622_v1 = vld [vmem:[%s4581_s10 + $0x10] sm:$0xff]  ;;  %v2621_v5 = vld [vmem:[%s4581_s10 + $0x8] sm:$0xff]  ;;  %v2840_v29 = vld [vmem:[%s4580_s9] ss:$0 sm:$0xff] }
 0x34e   :  { %v2384_v36 = vrot.slane %v2383_v50, 1  ;;  %v2484_v46 = vrot.slane %v2483_v51, 1  ;;  %v2449_v59 = vrot.slane %v2448_v21, 1  ;;  %v2408_v2 = vmax.f32 %v2406_v30, %v2407_v56  ;;  %v2842_v18 = vld [vmem:[%s4582_s11] ss:$0 sm:$0xff] }
 0x34f   :  { %v2418_v60 = vrot.slane %v2417_v54, 1  ;;  %v2369_v41 = vmax.f32 %v2367_v32, %v2368_v55  ;;  %v2472_v42 = vrot.slane %v2471_v23, 1  ;;  %v2439_v31 = vrot.slane %v2438_v44, 2 }
 0x350   :  { %v2385_v28 = vmax.f32 %v2383_v50, %v2384_v36  ;;  %v2409_v26 = vrot.slane %v2408_v2, 1  ;;  %v2450_v37 = vmax.f32 %v2448_v21, %v2449_v59  ;;  %v2485_v0 = vmax.f32 %v2483_v51, %v2484_v46 }
 0x351   :  { %v2419_v16 = vmax.f32 %v2417_v54, %v2418_v60  ;;  %v2370_v61 = vrot.slane %v2369_v41, 1  ;;  %v2473_v40 = vmax.f32 %v2471_v23, %v2472_v42  ;;  %v2440_v8 = vmax.f32 %v2438_v44, %v2439_v31 }
 0x352   :  { %v2393_v62 = vrot.slane %v2385_v28, %v4481_v24  ;;  %v2410_v52 = vmax.f32 %v2408_v2, %v2409_v26  ;;  %v2458_v34 = vrot.slane %v2450_v37, %v4481_v24  ;;  %v2493_v12 = vrot.slane %v2485_v0, %v4481_v24 }
 0x353   :  { %v2427_v13 = vrot.slane %v2419_v16, %v4481_v24  ;;  %v2371_v11 = vmax.f32 %v2369_v41, %v2370_v61  ;;  %2474 = vst.msk [vmem:[#allocation3 + $0x3] sm:$0x1] %vm2372_vm8, %v2473_v40  ;;  %v2441_v58 = vrot.slane %v2440_v8, 1  ;;  %v3329_v3 = vmov 0.0   ;;  %v2624_v24 = vld [vmem:[%s4581_s10 + $0x20] sm:$0xff]  ;;  %s2719_s10 = sshll.u32 %s3331_s15, 4  ;;  %s2720_s10 = int_to_ptr.vmem [resolvable:$true] %s2719_s10 }
 0x354   :  { %2394 = vrot.lane.b32.xlu0 %v2393_v62, %s3328_s18  ;;  %2411 = vst.msk [vmem:[#allocation3 + $0x2] sm:$0x1] %vm2372_vm8, %v2410_v52  ;;  %3275 = vmatprep.subr.mxu1 %v3329_v3  ;;  %s3304_s2 = scalar_lea.vmem %s2720_s10, 32  ;;  %p3309_p1 = scmp.lt.s32.totalorder %s2720_s10, %s2720_s10 }
 0x355   :  { %2428 = vrot.lane.b32.xlu1 %v2427_v13, %s3328_s18  ;;  %2373 = vst.msk [vmem:[#allocation3] sm:$0x1] %vm2372_vm8, %v2371_v11  ;;  %v2442_v10 = vmax.f32 %v2440_v8, %v2441_v58  ;;  %3276 = vmatpush3.msk.msra.mxu1 %vm190_vm0, %v2626_v17  ;;  %p3305_p0 = scmp.ne.s32.totalorder %s2720_s10, %s3304_s2  ;;  %p3310_p2 = scmp.lt.s32.totalorder %s3304_s2, %s3304_s2 }
 0x356   :  { %3277 = vmatprep.subr.mxu1 %v3329_v3  ;;  %3289 = vmatprep.mubr.msk.f32.mxu1 %vm3330_vm10, %v3329_v3 }
 0x357   :  { %2443 = vst.msk [vmem:[#allocation3 + $0x1] sm:$0x1] %vm2372_vm8, %v2442_v10  ;;  %3278 = vmatpush3.msra.mxu1 %v2625_v14  ;;  %p3311_p3 = por %p3310_p2, %p3309_p1 }
 0x358   :  { %2459 = vrot.lane.b32.xlu0 %v2458_v34, %s3328_s18  ;;  %3279 = vmatprep.subr.mxu1 %v3329_v3 }
 0x359   :  { %2494 = vrot.lane.b32.xlu1 %v2493_v12, %s3328_s18  ;;  %3280 = vmatpush3.msra.mxu1 %v2624_v24  ;;  %p3312_p4 = pnand %p3311_p3, %p3305_p0 }
 0x35a   :  { %3281 = vmatprep.subr.mxu1 %v3329_v3 }
 0x35b   :  { %3282 = vmatpush3.msra.mxu1 %v2623_v25 }
 0x35c   :  { %3283 = vmatprep.subr.mxu1 %v3329_v3 }
 0x35d   :  { %3284 = vmatpush3.msra.mxu1 %v2622_v1 }
 0x35e   :  { %3285 = vmatprep.subr.mxu1 %v3329_v3 }
 0x35f   :  { %3286 = vmatpush3.msra.mxu1 %v2621_v5 }
 0x360   :  { %3287 = vmatprep.subr.mxu1 %v3329_v3 }
 0x361   :  { %3288 = vmatpush3.msra.mxu1 %v2620_v7 }
 0x3c6   :  { %v2395_v38 = vpop.permute.xlu0 %2394 }
 0x3c7   :  { %v2429_v19 = vpop.permute.xlu1 %2428  ;;  %2398 = vst.msk [vmem:[#allocation3] sm:$0x1] %vm2397_vm9, %v2395_v38 }
 0x3c8   :  { %2431 = vst.msk [vmem:[#allocation3 + $0x2] sm:$0x1] %vm2397_vm9, %v2429_v19 }
 0x3ca   :  { %v2460_v39 = vpop.permute.xlu0 %2459 }
 0x3cb   :  { %v2495_v6 = vpop.permute.xlu1 %2494  ;;  %2462 = vst.msk [vmem:[#allocation3 + $0x1] sm:$0x1] %vm2397_vm9, %v2460_v39 }
 0x3cc   :  { %2497 = vst.msk [vmem:[#allocation3 + $0x3] sm:$0x1] %vm2397_vm9, %v2495_v6 }
 0x3d3   :  { %v2841_v48 = vld.sshfl [vmem:[#allocation3] sm:$0x33 pattern:$0x76325410] }
 0x3d4   :  { %v2546_v15 = vcombine.high %v2841_v48, %v2841_v48 }
 0x3d6   :  { %2613 = vmatprep.mubr.f32.mxu0 %v2546_v15 }
 0x3d7   :  { %2614 = vmatmul.mubr.f32.vlgmr.msra.gmra.mxu0 %v2841_v48 }
 0x497   :  { %v3024_v9 = vpop.f32.mrf.mxu0 }
 0x499   :  { %v3025_v30 = vpop.f32.mrf.mxu0 }
 0x49a   :  { %v3026_v27 = vadd.f32 %v3025_v30, %v3024_v9 }
 0x49c   :  { %v2616_v32 = vadd.f32 %v3026_v27, %v2840_v29 }
 0x49e   :  { %v2619_v45 = vmax.f32 %v2616_v32, 0.0 }
 0x4a0   :  { %3290 = vmatmul.mubr.msk.f32.vlgmr.msra.gmra.mxu1 %vm2634_vm11, %v2619_v45 }
 0x560   :  { %v2707_v50 = vpop.f32.mrf.mxu1 }
 0x561   :  { %v2708_v51 = vadd.f32 %v2842_v18, %v2707_v50 }
 0x562   :  { %v3291_v21 = vpop.f32.mrf.mxu1 }
 0x563   :  { %2712 = vst.msk [vmem:[#allocation4] sm:$0x3] %vm2711_vm12, %v2708_v51 }
 0x564   :  { %3315 = shalt.err (!%p3312_p4)
}
 0x565   :  { %2722 = dma.vmem_to_hbm [thread:$0]  %s2720_s10, 32, %s4583_s12, [#allocation5]  }
 0x566   :  { %3324 = dma.done.wait [#allocation5], 32  }
 0x567   :  { %3325 = vsyncadd [#allocation5], 4294967264 }
 0x568   :  { %2726 = vsyncpa [#allocation5], 1 }

</bundles_post_ra>
